<compile_context>
chip_gen: v6e
topology: v6e:2x2x1
jax: 0.10.0
libtpu: 0.0.40
codegen_flags: <defaults>
</compile_context>

<pallas_src>
import numpy as np
import jax
import jax.numpy as jnp
from jax.experimental import pallas as pl
from jax.experimental.pallas import tpu as pltpu

BATCH = 2
TIME_STEP = 8            # n (encoder sequence length == Conv1d channels)
X_SIZE = 10              # config.input_size
HUMANSIZE = 6
NATURESIZE = 5
EMB = 32                 # config.embedding_size
HID = 32                 # config.hidden_size (== EMB so Get_h_c states feed the LSTM)
LSTM_LAYERS = 1
OUT_SIZE = 1
DEC_STEPS = 4            # decoder_future_num

FEAT = X_SIZE + (HUMANSIZE + TIME_STEP) + (NATURESIZE + TIME_STEP)   # 37
FEAT_PAD = 40            # 37 features + ones column (x-emb bias) + 2 zero pad
STATIC_W = 16            # 11 static features + ones column (fc1 bias) + 4 zero pad
C3 = 3 * EMB             # 96
NB = TIME_STEP * BATCH   # 16 time-major ECA rows (row = t*B + b)

# ---- misc slab row layout (128, 128) f32 ----
MISC_FC1_R = 0           # rows 0:16 , cols 0:32  : fc1 weight^T (11 rows) + bias row + zero pad
MISC_HC_R = 16           # rows 16:112, cols 0:64 : merged [h0 | c0] weight^T
MISC_VEC_R = 112         # 1-row parameter vectors below
(V_LN1_G, V_LN1_B, V_FC2_B, V_LN2_G, V_LN2_B,
 V_HC_B, V_ENC_B, V_DEC_B, V_OUT_W, V_OUT_B) = range(10)

# ---- w32 slab column layout (32, 640) f32 (128-lane-aligned blocks) ----
W32_FC2, W32_ENC_IH, W32_ENC_HH, W32_DEC_IH, W32_DEC_HH = 0, 128, 256, 384, 512

# Fixed channel shuffle from ECA.__init__ (np.random.shuffle), made deterministic.
_rng = np.random.RandomState(0)
SHUFFLE = np.arange(C3)
_rng.shuffle(SHUFFLE)
INV_SHUFFLE = np.argsort(SHUFFLE)

# Static gather/shift matrices folding (conv tap k) + (un-shuffle) + ([:EMB] pick):
#   (mask @ G[k])[r, j] = mask[r, INV_SHUFFLE[j] + k - 3]   (0 if out of range)
# Out-of-range taps are zero, exactly matching Conv1d's zero padding, so this is
# valid for ANY permutation.  Used only at prepare_params time (folded into the
# ECA weight); never shipped to the kernel.
_G = np.zeros((5, C3, EMB), np.float32)
for _k in range(5):
    for _j in range(EMB):
        _m = int(INV_SHUFFLE[_j]) + _k - 3
        if 0 <= _m < C3:
            _G[_k, _m, _j] = 1.0
GATHER_CONV = jnp.asarray(_G)

_vmem = lambda: pl.BlockSpec(memory_space=pltpu.MemorySpace.VMEM)


# ---------------- single fused kernel ----------------
def _net_kernel(static_ref, feats_ref, decx_ref, misc_ref, eca_ref, w32_ref, out_ref):
    f32 = jnp.float32
    B, N, H, E = BATCH, TIME_STEP, HID, EMB

    def _mm(a, b):
        return jnp.dot(a, b, preferred_element_type=f32)

    def _ln(x, g, b):
        mu = jnp.mean(x, axis=-1, keepdims=True)
        d = x - mu
        var = jnp.mean(d * d, axis=-1, keepdims=True)
        return d * jax.lax.rsqrt(var + 1e-5) * g + b

    def vec(r, w):                       # (1, w) parameter row from the misc slab
        return misc_ref[MISC_VEC_R + r:MISC_VEC_R + r + 1, 0:w]

    # ---- Get_h_c: fc1 -> LN -> ReLU -> fc2 -> LN -> ReLU -> [h0 | c0] ----
    t1 = _mm(static_ref[...], misc_ref[MISC_FC1_R:MISC_FC1_R + STATIC_W, 0:E])   # bias via ones col
    t1 = jnp.maximum(_ln(t1, vec(V_LN1_G, E), vec(V_LN1_B, E)), 0.0)             # (B, E)
    t2 = _mm(t1, w32_ref[:, W32_FC2:W32_FC2 + 3 * E]) + vec(V_FC2_B, 3 * E)
    t2 = jnp.maximum(_ln(t2, vec(V_LN2_G, 3 * E), vec(V_LN2_B, 3 * E)), 0.0)     # (B, 3E)
    hc = _mm(t2, misc_ref[MISC_HC_R:MISC_HC_R + 3 * E, 0:2 * H]) + vec(V_HC_B, 2 * H)
    h = hc[:, 0:H]
    c = hc[:, H:2 * H]

    # ---- ECA: ONE lane-dense matmul.  Cols 0:160 = (shuffle + conv tap k +
    #      un-shuffle + [:E] pick) folded per tap; cols 160:192 = x-embedding
    #      (bias carried by the ones column of feats). ----
    emb = _mm(feats_ref[...], eca_ref[0:FEAT_PAD, :])                  # (NB, 192)
    gb = eca_ref[FEAT_PAD:FEAT_PAD + NB, :]                            # (NB, 192): [convw_exp | gate_bias]
    prod = gb[:, 0:5 * E] * emb[:, 0:5 * E]                            # per-row conv taps (pure VPU)
    gate = (gb[:, 5 * E:6 * E] + prod[:, 0:E] + prod[:, E:2 * E] + prod[:, 2 * E:3 * E]
            + prod[:, 3 * E:4 * E] + prod[:, 4 * E:5 * E])             # (NB, E)
    gate = jnp.maximum(gate, 0.0)                                      # ReLU
    mx = jnp.max(gate, axis=-1, keepdims=True)                         # softmax(dim=2)
    ex = jnp.exp(gate - mx)
    sm = ex * pl.reciprocal(jnp.sum(ex, axis=-1, keepdims=True), approx=True)
    enc_in = emb[:, 5 * E:6 * E] * sm                                  # x_emb * gate  (NB, E)

    # ---- encoder LSTM (input projection + bias hoisted out of the recurrence) ----
    enc_gx = _mm(enc_in, w32_ref[:, W32_ENC_IH:W32_ENC_IH + 4 * H]) + vec(V_ENC_B, 4 * H)
    whh_e = w32_ref[:, W32_ENC_HH:W32_ENC_HH + 4 * H]                  # hoisted; stays in vregs
    # TODO(synk): weight-stationary MXU driving (pltpu.matmul_push_rhs/acc_lhs/pop)
    # would remove the per-step RHS reload but is kept off for lowering robustness.
    for t in range(N):
        gates = enc_gx[t * B:(t + 1) * B, :] + _mm(h, whh_e)           # (B, 4H)
        sg = jax.nn.sigmoid(gates)                                     # full-vreg activations
        th = jnp.tanh(gates)
        c = sg[:, H:2 * H] * c + sg[:, 0:H] * th[:, 2 * H:3 * H]
        h = sg[:, 3 * H:4 * H] * jnp.tanh(c)

    # ---- decoder LSTM (teacher forcing, totrain=True); h_t kept in vregs ----
    dec_gx = _mm(decx_ref[...], w32_ref[:, W32_DEC_IH:W32_DEC_IH + 4 * H]) + vec(V_DEC_B, 4 * H)
    whh_d = w32_ref[:, W32_DEC_HH:W32_DEC_HH + 4 * H]
    hs = []
    for t in range(DEC_STEPS):
        gates = dec_gx[t * B:(t + 1) * B, :] + _mm(h, whh_d)
        sg = jax.nn.sigmoid(gates)
        th = jnp.tanh(gates)
        c = sg[:, H:2 * H] * c + sg[:, 0:H] * th[:, 2 * H:3 * H]
        h = sg[:, 3 * H:4 * H] * jnp.tanh(c)
        hs.append(h)
    hs_all = jnp.concatenate(hs, axis=0)                               # (T*B, H) — no VMEM round-trip

    # ---- Linear(H,1) head on the VPU + single lane-dense packed output ----
    outs = jnp.sum(hs_all * vec(V_OUT_W, H), axis=-1, keepdims=True) + vec(V_OUT_B, 1)   # (T*B, 1)
    hc_rows = jnp.concatenate([h, c, jnp.zeros((DEC_STEPS * B - 2 * B, H), f32)], axis=0)
    out_ref[...] = jnp.concatenate(
        [outs, hc_rows, jnp.zeros((DEC_STEPS * B, 128 - 1 - H), f32)], axis=1)           # (8, 128)


def _net_pallas(static, feats, dec_feed, w):
    return pl.pallas_call(
        _net_kernel,
        out_shape=jax.ShapeDtypeStruct((DEC_STEPS * BATCH, 128), jnp.float32),
        in_specs=[_vmem()] * 6,
        out_specs=_vmem(),
    )(static, feats, dec_feed, w["misc"], w["eca"], w["w32"])


# ---------------- parameters ----------------
def _init_linear(key, out_dim, in_dim):
    k1, k2 = jax.random.split(key)
    bound = 1.0 / np.sqrt(in_dim)
    w = jax.random.uniform(k1, (out_dim, in_dim), jnp.float32, -bound, bound)
    b = jax.random.uniform(k2, (out_dim,), jnp.float32, -bound, bound)
    return w, b


def init_params(key):
    keys = jax.random.split(key, 16)
    p = {}
    # ECA
    p["xlin"] = _init_linear(keys[0], EMB, X_SIZE)
    p["hlin"] = _init_linear(keys[1], EMB, HUMANSIZE + TIME_STEP)
    p["nlin"] = _init_linear(keys[2], EMB, NATURESIZE + TIME_STEP)
    p["conv_w"] = jax.random.uniform(keys[3], (TIME_STEP, 5), jnp.float32, -0.4, 0.4)
    p["conv_b"] = jax.random.uniform(keys[4], (TIME_STEP,), jnp.float32, -0.4, 0.4)
    # Get_h_c
    p["fc1"] = _init_linear(keys[5], EMB, HUMANSIZE + NATURESIZE)
    p["ln1"] = (jnp.ones((EMB,), jnp.float32), jnp.zeros((EMB,), jnp.float32))
    p["fc2"] = _init_linear(keys[6], 3 * EMB, EMB)
    p["ln2"] = (jnp.ones((3 * EMB,), jnp.float32), jnp.zeros((3 * EMB,), jnp.float32))
    p["h0"] = _init_linear(keys[7], EMB, 3 * EMB)
    p["c0"] = _init_linear(keys[8], EMB, 3 * EMB)
    # encoder LSTM (1 layer)
    p["enc_wih"], p["enc_bih"] = _init_linear(keys[9], 4 * HID, EMB)
    p["enc_whh"], p["enc_bhh"] = _init_linear(keys[10], 4 * HID, HID)
    # decoder LSTM (1 layer) + output head
    p["dec_wih"], p["dec_bih"] = _init_linear(keys[11], 4 * HID, EMB)
    p["dec_whh"], p["dec_bhh"] = _init_linear(keys[12], 4 * HID, HID)
    p["dec_out"] = _init_linear(keys[13], OUT_SIZE, HID)
    return p


def prepare_params(p):
    """One-time weight packing: 3 VMEM slabs, all folds/transposes hoisted here."""
    f32 = jnp.float32

    # ---- ECA fold: block-diag embed + shuffle + conv gathers + biases -> one weight ----
    Wx, bx = p["xlin"]
    Wh, bh = p["hlin"]
    Wn, bn = p["nlin"]
    Wbig = jnp.zeros((FEAT, C3), f32)
    Wbig = Wbig.at[0:X_SIZE, 0:EMB].set(Wx.T)
    Wbig = Wbig.at[X_SIZE:X_SIZE + HUMANSIZE + TIME_STEP, EMB:2 * EMB].set(Wh.T)
    Wbig = Wbig.at[X_SIZE + HUMANSIZE + TIME_STEP:, 2 * EMB:].set(Wn.T)
    bbig = jnp.concatenate([bx, bh, bn])
    Wshuf, bshuf = Wbig[:, SHUFFLE], bbig[SHUFFLE]
    Wfold = jnp.concatenate([Wshuf @ GATHER_CONV[k] for k in range(5)], axis=1)   # (37, 160)
    Bfold = jnp.stack([bshuf @ GATHER_CONV[k] for k in range(5)], axis=0)         # (5, 32)

    conv_w_full = jnp.repeat(p["conv_w"], BATCH, axis=0)                 # (NB, 5)  row = t*B + b
    conv_b_full = jnp.repeat(p["conv_b"], BATCH).reshape(NB, 1)          # (NB, 1)
    gate_bias = conv_b_full + conv_w_full @ Bfold                        # (NB, 32)
    convw_exp = jnp.repeat(conv_w_full, EMB, axis=1)                     # (NB, 160) tap k at cols k*32:(k+1)*32

    eca_w = jnp.zeros((FEAT_PAD, 6 * EMB), f32)                          # (40, 192)
    eca_w = eca_w.at[0:FEAT, 0:5 * EMB].set(Wfold)
    eca_w = eca_w.at[0:FEAT, 5 * EMB:].set(Wbig[:, 0:EMB])               # x-embedding columns
    eca_w = eca_w.at[FEAT, 5 * EMB:].set(bx)                             # ones column carries x bias
    eca = jnp.concatenate(
        [eca_w, jnp.concatenate([convw_exp, gate_bias], axis=1)], axis=0)          # (56, 192)

    # ---- w32 slab: every 32-row weight matrix at a 128-lane-aligned column block ----
    fc2_pad = jnp.zeros((EMB, 128), f32).at[:, 0:3 * EMB].set(p["fc2"][0].T)
    w32 = jnp.concatenate([fc2_pad, p["enc_wih"].T, p["enc_whh"].T,
                           p["dec_wih"].T, p["dec_whh"].T], axis=1)                # (32, 640)

    # ---- misc slab: remaining small matrices + every 1-row bias / LN vector ----
    misc = jnp.zeros((128, 128), f32)
    fc1_aug = jnp.concatenate([p["fc1"][0].T, p["fc1"][1].reshape(1, -1)], axis=0)  # (12, 32)
    misc = misc.at[MISC_FC1_R:MISC_FC1_R + 12, 0:EMB].set(fc1_aug)
    hc_wT = jnp.concatenate([p["h0"][0].T, p["c0"][0].T], axis=1)                   # (96, 64)
    misc = misc.at[MISC_HC_R:MISC_HC_R + 3 * EMB, 0:2 * HID].set(hc_wT)
    r = MISC_VEC_R
    misc = misc.at[r + V_LN1_G, 0:EMB].set(p["ln1"][0])
    misc = misc.at[r + V_LN1_B, 0:EMB].set(p["ln1"][1])
    misc = misc.at[r + V_FC2_B, 0:3 * EMB].set(p["fc2"][1])
    misc = misc.at[r + V_LN2_G, 0:3 * EMB].set(p["ln2"][0])
    misc = misc.at[r + V_LN2_B, 0:3 * EMB].set(p["ln2"][1])
    misc = misc.at[r + V_HC_B, 0:2 * HID].set(jnp.concatenate([p["h0"][1], p["c0"][1]]))
    misc = misc.at[r + V_ENC_B, 0:4 * HID].set(p["enc_bih"] + p["enc_bhh"])
    misc = misc.at[r + V_DEC_B, 0:4 * HID].set(p["dec_bih"] + p["dec_bhh"])
    misc = misc.at[r + V_OUT_W, 0:HID].set(p["dec_out"][0][0])
    misc = misc.at[r + V_OUT_B, 0].set(p["dec_out"][1][0])
    return {"misc": misc, "eca": eca, "w32": w32}


# ---------------- Net.forward (jitted wrapper + one pallas_call) ----------------
# TODO(synk): Encoder / ATT_Decoder source files were not provided; implemented as a
# standard 1-layer LSTM encoder and a 1-layer LSTM decoder with a Linear(H,1) head.
@jax.jit
def net_forward(prep, x, decoder_input, human, nature):
    b, n, _ = x.shape
    # Get_h_c static features (+ ones column folding the fc1 bias, zero-padded to 16)
    static = jnp.concatenate(
        [human[:, :LSTM_LAYERS, :HUMANSIZE], nature[:, :LSTM_LAYERS, :NATURESIZE],
         jnp.ones((b, LSTM_LAYERS, 1), jnp.float32),
         jnp.zeros((b, LSTM_LAYERS, STATIC_W - HUMANSIZE - NATURESIZE - 1), jnp.float32)],
        axis=2).reshape(b * LSTM_LAYERS, STATIC_W)
    # time-major flattened ECA features (row = t*B + b), + ones column, zero-padded to 40
    feats = jnp.concatenate(
        [x, human, nature, jnp.ones((b, n, 1), jnp.float32),
         jnp.zeros((b, n, FEAT_PAD - FEAT - 1), jnp.float32)], axis=-1)
    feats = feats.transpose(1, 0, 2).reshape(n * b, FEAT_PAD)
    # teacher-forcing feed order from the original loop: step t consumes
    # decoder_input[0] for t in {0,1} and decoder_input[t-1] afterwards
    # (matches the PyTorch code; decoder_input[-1] is never used).
    T = decoder_input.shape[0]
    idx = np.array([0] + list(range(T - 1)), np.int32)
    dec_feed = decoder_input[idx].reshape(T * b, EMB)

    packed = _net_pallas(static, feats, dec_feed, prep)   # (T*B, 128): [outs | h;c | pad]
    outs = packed[:, 0:OUT_SIZE].reshape(T, b, OUT_SIZE)
    h = packed[0:b, 1:1 + HID][None, :, :]
    c = packed[b:2 * b, 1:1 + HID][None, :, :]
    return outs, h, c


if __name__ == "__main__":
    key = jax.random.PRNGKey(0)
    kp, kx, kh, kn, kd = jax.random.split(key, 5)
    params = init_params(kp)
    prep = prepare_params(params)

    x = jax.random.normal(kx, (BATCH, TIME_STEP, X_SIZE), jnp.float32)
    human = jax.random.normal(kh, (BATCH, TIME_STEP, HUMANSIZE + TIME_STEP), jnp.float32)
    nature = jax.random.normal(kn, (BATCH, TIME_STEP, NATURESIZE + TIME_STEP), jnp.float32)
    decoder_input = jax.random.normal(kd, (DEC_STEPS, BATCH, EMB), jnp.float32)

    outs, h, c = net_forward(prep, x, decoder_input, human, nature)
    jax.block_until_ready((outs, h, c))
    assert outs.shape == (DEC_STEPS, BATCH, OUT_SIZE)
    assert h.shape == (LSTM_LAYERS, BATCH, HID)
    assert c.shape == (LSTM_LAYERS, BATCH, HID)
    assert bool(jnp.isfinite(outs).all())
    assert bool(jnp.isfinite(h).all()) and bool(jnp.isfinite(c).all())
    print("KERNEL_OK")
</pallas_src>

<mosaic_0001>
module attributes {stable_mosaic.version = 11 : i64} {
  func.func @_net_kernel(%arg0: memref<2x16xf32, #tpu.memory_space<vmem>>, %arg1: memref<16x40xf32, #tpu.memory_space<vmem>>, %arg2: memref<8x32xf32, #tpu.memory_space<vmem>>, %arg3: memref<128x128xf32, #tpu.memory_space<vmem>>, %arg4: memref<56x192xf32, #tpu.memory_space<vmem>>, %arg5: memref<32x640xf32, #tpu.memory_space<vmem>>, %arg6: memref<8x128xf32, #tpu.memory_space<vmem>>) attributes {dimension_semantics = [], scalar_prefetch = 0 : i64, scratch_operands = 0 : i64, tpu.core_type = #tpu.core_type<tc>} {
    %c0 = arith.constant 0 : index
    %c0_0 = arith.constant 0 : index
    %0 = vector.load %arg0[%c0, %c0_0] : memref<2x16xf32, #tpu.memory_space<vmem>>, vector<2x16xf32>
    %c0_1 = arith.constant 0 : index
    %c0_2 = arith.constant 0 : index
    %1 = vector.load %arg3[%c0_1, %c0_2] : memref<128x128xf32, #tpu.memory_space<vmem>>, vector<16x32xf32>
    %cst = arith.constant dense<0.000000e+00> : vector<2x32xf32>
    %2 = tpu.matmul %0, %1, %cst {dimension_numbers = #tpu.dot_dimension_numbers<[1], [0], [0], [1], [0, 0, 1, 1], [], []>} : vector<2x16xf32>, vector<16x32xf32>, vector<2x32xf32> -> vector<2x32xf32>
    %c112 = arith.constant 112 : index
    %c0_3 = arith.constant 0 : index
    %3 = vector.load %arg3[%c112, %c0_3] : memref<128x128xf32, #tpu.memory_space<vmem>>, vector<1x32xf32>
    %c113 = arith.constant 113 : index
    %c0_4 = arith.constant 0 : index
    %4 = vector.load %arg3[%c113, %c0_4] : memref<128x128xf32, #tpu.memory_space<vmem>>, vector<1x32xf32>
    %cst_5 = arith.constant dense<0.000000e+00> : vector<2xf32>
    %5 = vector.multi_reduction <add>, %2, %cst_5 [1] : vector<2x32xf32> to vector<2xf32>
    %6 = vector.shape_cast %5 : vector<2xf32> to vector<2x1xf32>
    %cst_6 = arith.constant 3.200000e+01 : f32
    %7 = vector.broadcast %cst_6 : f32 to vector<2x1xf32>
    %8 = arith.divf %6, %7 : vector<2x1xf32>
    %9 = vector.broadcast %8 : vector<2x1xf32> to vector<2x32xf32>
    %10 = arith.subf %2, %9 : vector<2x32xf32>
    %11 = arith.mulf %10, %10 : vector<2x32xf32>
    %cst_7 = arith.constant dense<0.000000e+00> : vector<2xf32>
    %12 = vector.multi_reduction <add>, %11, %cst_7 [1] : vector<2x32xf32> to vector<2xf32>
    %13 = vector.shape_cast %12 : vector<2xf32> to vector<2x1xf32>
    %cst_8 = arith.constant 3.200000e+01 : f32
    %14 = vector.broadcast %cst_8 : f32 to vector<2x1xf32>
    %15 = arith.divf %13, %14 : vector<2x1xf32>
    %cst_9 = arith.constant 9.99999974E-6 : f32
    %16 = vector.broadcast %cst_9 : f32 to vector<2x1xf32>
    %17 = arith.addf %15, %16 : vector<2x1xf32>
    %18 = math.rsqrt %17 : vector<2x1xf32>
    %19 = vector.broadcast %18 : vector<2x1xf32> to vector<2x32xf32>
    %20 = arith.mulf %10, %19 : vector<2x32xf32>
    %21 = vector.broadcast %3 : vector<1x32xf32> to vector<2x32xf32>
    %22 = arith.mulf %20, %21 : vector<2x32xf32>
    %23 = vector.broadcast %4 : vector<1x32xf32> to vector<2x32xf32>
    %24 = arith.addf %22, %23 : vector<2x32xf32>
    %cst_10 = arith.constant 0.000000e+00 : f32
    %25 = vector.broadcast %cst_10 : f32 to vector<2x32xf32>
    %26 = arith.maximumf %24, %25 : vector<2x32xf32>
    %c0_11 = arith.constant 0 : index
    %c0_12 = arith.constant 0 : index
    %27 = vector.load %arg5[%c0_11, %c0_12] : memref<32x640xf32, #tpu.memory_space<vmem>>, vector<32x96xf32>
    %cst_13 = arith.constant dense<0.000000e+00> : vector<2x96xf32>
    %28 = tpu.matmul %26, %27, %cst_13 {dimension_numbers = #tpu.dot_dimension_numbers<[1], [0], [0], [1], [0, 0, 1, 1], [], []>} : vector<2x32xf32>, vector<32x96xf32>, vector<2x96xf32> -> vector<2x96xf32>
    %c114 = arith.constant 114 : index
    %c0_14 = arith.constant 0 : index
    %29 = vector.load %arg3[%c114, %c0_14] : memref<128x128xf32, #tpu.memory_space<vmem>>, vector<1x96xf32>
    %30 = vector.broadcast %29 : vector<1x96xf32> to vector<2x96xf32>
    %31 = arith.addf %28, %30 : vector<2x96xf32>
    %c115 = arith.constant 115 : index
    %c0_15 = arith.constant 0 : index
    %32 = vector.load %arg3[%c115, %c0_15] : memref<128x128xf32, #tpu.memory_space<vmem>>, vector<1x96xf32>
    %c116 = arith.constant 116 : index
    %c0_16 = arith.constant 0 : index
    %33 = vector.load %arg3[%c116, %c0_16] : memref<128x128xf32, #tpu.memory_space<vmem>>, vector<1x96xf32>
    %cst_17 = arith.constant dense<0.000000e+00> : vector<2xf32>
    %34 = vector.multi_reduction <add>, %31, %cst_17 [1] : vector<2x96xf32> to vector<2xf32>
    %35 = vector.shape_cast %34 : vector<2xf32> to vector<2x1xf32>
    %cst_18 = arith.constant 9.600000e+01 : f32
    %36 = vector.broadcast %cst_18 : f32 to vector<2x1xf32>
    %37 = arith.divf %35, %36 : vector<2x1xf32>
    %38 = vector.broadcast %37 : vector<2x1xf32> to vector<2x96xf32>
    %39 = arith.subf %31, %38 : vector<2x96xf32>
    %40 = arith.mulf %39, %39 : vector<2x96xf32>
    %cst_19 = arith.constant dense<0.000000e+00> : vector<2xf32>
    %41 = vector.multi_reduction <add>, %40, %cst_19 [1] : vector<2x96xf32> to vector<2xf32>
    %42 = vector.shape_cast %41 : vector<2xf32> to vector<2x1xf32>
    %cst_20 = arith.constant 9.600000e+01 : f32
    %43 = vector.broadcast %cst_20 : f32 to vector<2x1xf32>
    %44 = arith.divf %42, %43 : vector<2x1xf32>
    %cst_21 = arith.constant 9.99999974E-6 : f32
    %45 = vector.broadcast %cst_21 : f32 to vector<2x1xf32>
    %46 = arith.addf %44, %45 : vector<2x1xf32>
    %47 = math.rsqrt %46 : vector<2x1xf32>
    %48 = vector.broadcast %47 : vector<2x1xf32> to vector<2x96xf32>
    %49 = arith.mulf %39, %48 : vector<2x96xf32>
    %50 = vector.broadcast %32 : vector<1x96xf32> to vector<2x96xf32>
    %51 = arith.mulf %49, %50 : vector<2x96xf32>
    %52 = vector.broadcast %33 : vector<1x96xf32> to vector<2x96xf32>
    %53 = arith.addf %51, %52 : vector<2x96xf32>
    %cst_22 = arith.constant 0.000000e+00 : f32
    %54 = vector.broadcast %cst_22 : f32 to vector<2x96xf32>
    %55 = arith.maximumf %53, %54 : vector<2x96xf32>
    %c16 = arith.constant 16 : index
    %c0_23 = arith.constant 0 : index
    %56 = vector.load %arg3[%c16, %c0_23] : memref<128x128xf32, #tpu.memory_space<vmem>>, vector<96x64xf32>
    %cst_24 = arith.constant dense<0.000000e+00> : vector<2x64xf32>
    %57 = tpu.matmul %55, %56, %cst_24 {dimension_numbers = #tpu.dot_dimension_numbers<[1], [0], [0], [1], [0, 0, 1, 1], [], []>} : vector<2x96xf32>, vector<96x64xf32>, vector<2x64xf32> -> vector<2x64xf32>
    %c117 = arith.constant 117 : index
    %c0_25 = arith.constant 0 : index
    %58 = vector.load %arg3[%c117, %c0_25] : memref<128x128xf32, #tpu.memory_space<vmem>>, vector<1x64xf32>
    %59 = vector.broadcast %58 : vector<1x64xf32> to vector<2x64xf32>
    %60 = arith.addf %57, %59 : vector<2x64xf32>
    %61 = vector.extract_strided_slice %60 {offsets = [0, 0], sizes = [2, 32], strides = [1, 1]} : vector<2x64xf32> to vector<2x32xf32>
    %62 = vector.extract_strided_slice %60 {offsets = [0, 32], sizes = [2, 32], strides = [1, 1]} : vector<2x64xf32> to vector<2x32xf32>
    %c0_26 = arith.constant 0 : index
    %c0_27 = arith.constant 0 : index
    %63 = vector.load %arg1[%c0_26, %c0_27] : memref<16x40xf32, #tpu.memory_space<vmem>>, vector<16x40xf32>
    %c0_28 = arith.constant 0 : index
    %c0_29 = arith.constant 0 : index
    %64 = vector.load %arg4[%c0_28, %c0_29] : memref<56x192xf32, #tpu.memory_space<vmem>>, vector<40x192xf32>
    %cst_30 = arith.constant dense<0.000000e+00> : vector<16x192xf32>
    %65 = tpu.matmul %63, %64, %cst_30 {dimension_numbers = #tpu.dot_dimension_numbers<[1], [0], [0], [1], [0, 0, 1, 1], [], []>} : vector<16x40xf32>, vector<40x192xf32>, vector<16x192xf32> -> vector<16x192xf32>
    %c40 = arith.constant 40 : index
    %c0_31 = arith.constant 0 : index
    %66 = vector.load %arg4[%c40, %c0_31] : memref<56x192xf32, #tpu.memory_space<vmem>>, vector<16x192xf32>
    %67 = vector.extract_strided_slice %66 {offsets = [0, 0], sizes = [16, 160], strides = [1, 1]} : vector<16x192xf32> to vector<16x160xf32>
    %68 = vector.extract_strided_slice %65 {offsets = [0, 0], sizes = [16, 160], strides = [1, 1]} : vector<16x192xf32> to vector<16x160xf32>
    %69 = arith.mulf %67, %68 : vector<16x160xf32>
    %70 = vector.extract_strided_slice %66 {offsets = [0, 160], sizes = [16, 32], strides = [1, 1]} : vector<16x192xf32> to vector<16x32xf32>
    %71 = vector.extract_strided_slice %69 {offsets = [0, 0], sizes = [16, 32], strides = [1, 1]} : vector<16x160xf32> to vector<16x32xf32>
    %72 = arith.addf %70, %71 : vector<16x32xf32>
    %73 = vector.extract_strided_slice %69 {offsets = [0, 32], sizes = [16, 32], strides = [1, 1]} : vector<16x160xf32> to vector<16x32xf32>
    %74 = arith.addf %72, %73 : vector<16x32xf32>
    %75 = vector.extract_strided_slice %69 {offsets = [0, 64], sizes = [16, 32], strides = [1, 1]} : vector<16x160xf32> to vector<16x32xf32>
    %76 = arith.addf %74, %75 : vector<16x32xf32>
    %77 = vector.extract_strided_slice %69 {offsets = [0, 96], sizes = [16, 32], strides = [1, 1]} : vector<16x160xf32> to vector<16x32xf32>
    %78 = arith.addf %76, %77 : vector<16x32xf32>
    %79 = vector.extract_strided_slice %69 {offsets = [0, 128], sizes = [16, 32], strides = [1, 1]} : vector<16x160xf32> to vector<16x32xf32>
    %80 = arith.addf %78, %79 : vector<16x32xf32>
    %cst_32 = arith.constant 0.000000e+00 : f32
    %81 = vector.broadcast %cst_32 : f32 to vector<16x32xf32>
    %82 = arith.maximumf %80, %81 : vector<16x32xf32>
    %cst_33 = arith.constant dense<0xFF800000> : vector<16xf32>
    %83 = vector.multi_reduction <maximumf>, %82, %cst_33 [1] : vector<16x32xf32> to vector<16xf32>
    %84 = vector.shape_cast %83 : vector<16xf32> to vector<16x1xf32>
    %85 = vector.broadcast %84 : vector<16x1xf32> to vector<16x32xf32>
    %86 = arith.subf %82, %85 : vector<16x32xf32>
    %87 = math.exp %86 : vector<16x32xf32>
    %cst_34 = arith.constant dense<0.000000e+00> : vector<16xf32>
    %88 = vector.multi_reduction <add>, %87, %cst_34 [1] : vector<16x32xf32> to vector<16xf32>
    %89 = vector.shape_cast %88 : vector<16xf32> to vector<16x1xf32>
    %90 = tpu.reciprocal %89 {approx = true} : vector<16x1xf32> -> vector<16x1xf32>
    %91 = vector.broadcast %90 : vector<16x1xf32> to vector<16x32xf32>
    %92 = arith.mulf %87, %91 : vector<16x32xf32>
    %93 = vector.extract_strided_slice %65 {offsets = [0, 160], sizes = [16, 32], strides = [1, 1]} : vector<16x192xf32> to vector<16x32xf32>
    %94 = arith.mulf %93, %92 : vector<16x32xf32>
    %c0_35 = arith.constant 0 : index
    %c128 = arith.constant 128 : index
    %95 = vector.load %arg5[%c0_35, %c128] : memref<32x640xf32, #tpu.memory_space<vmem>>, vector<32x128xf32>
    %cst_36 = arith.constant dense<0.000000e+00> : vector<16x128xf32>
    %96 = tpu.matmul %94, %95, %cst_36 {dimension_numbers = #tpu.dot_dimension_numbers<[1], [0], [0], [1], [0, 0, 1, 1], [], []>} : vector<16x32xf32>, vector<32x128xf32>, vector<16x128xf32> -> vector<16x128xf32>
    %c118 = arith.constant 118 : index
    %c0_37 = arith.constant 0 : index
    %97 = vector.load %arg3[%c118, %c0_37] : memref<128x128xf32, #tpu.memory_space<vmem>>, vector<1x128xf32>
    %98 = vector.broadcast %97 : vector<1x128xf32> to vector<16x128xf32>
    %99 = arith.addf %96, %98 : vector<16x128xf32>
    %c0_38 = arith.constant 0 : index
    %c256 = arith.constant 256 : index
    %100 = vector.load %arg5[%c0_38, %c256] : memref<32x640xf32, #tpu.memory_space<vmem>>, vector<32x128xf32>
    %101 = vector.extract_strided_slice %99 {offsets = [0, 0], sizes = [2, 128], strides = [1, 1]} : vector<16x128xf32> to vector<2x128xf32>
    %cst_39 = arith.constant dense<0.000000e+00> : vector<2x128xf32>
    %102 = tpu.matmul %61, %100, %cst_39 {dimension_numbers = #tpu.dot_dimension_numbers<[1], [0], [0], [1], [0, 0, 1, 1], [], []>} : vector<2x32xf32>, vector<32x128xf32>, vector<2x128xf32> -> vector<2x128xf32>
    %103 = arith.addf %101, %102 : vector<2x128xf32>
    %104 = arith.negf %103 : vector<2x128xf32>
    %105 = math.exp %104 : vector<2x128xf32>
    %cst_40 = arith.constant 1.000000e+00 : f32
    %106 = vector.broadcast %cst_40 : f32 to vector<2x128xf32>
    %107 = arith.addf %106, %105 : vector<2x128xf32>
    %108 = arith.divf %106, %107 : vector<2x128xf32>
    %109 = math.tanh %103 : vector<2x128xf32>
    %110 = vector.extract_strided_slice %108 {offsets = [0, 32], sizes = [2, 32], strides = [1, 1]} : vector<2x128xf32> to vector<2x32xf32>
    %111 = arith.mulf %110, %62 : vector<2x32xf32>
    %112 = vector.extract_strided_slice %108 {offsets = [0, 0], sizes = [2, 32], strides = [1, 1]} : vector<2x128xf32> to vector<2x32xf32>
    %113 = vector.extract_strided_slice %109 {offsets = [0, 64], sizes = [2, 32], strides = [1, 1]} : vector<2x128xf32> to vector<2x32xf32>
    %114 = arith.mulf %112, %113 : vector<2x32xf32>
    %115 = arith.addf %111, %114 : vector<2x32xf32>
    %116 = vector.extract_strided_slice %108 {offsets = [0, 96], sizes = [2, 32], strides = [1, 1]} : vector<2x128xf32> to vector<2x32xf32>
    %117 = math.tanh %115 : vector<2x32xf32>
    %118 = arith.mulf %116, %117 : vector<2x32xf32>
    %119 = vector.extract_strided_slice %99 {offsets = [2, 0], sizes = [2, 128], strides = [1, 1]} : vector<16x128xf32> to vector<2x128xf32>
    %cst_41 = arith.constant dense<0.000000e+00> : vector<2x128xf32>
    %120 = tpu.matmul %118, %100, %cst_41 {dimension_numbers = #tpu.dot_dimension_numbers<[1], [0], [0], [1], [0, 0, 1, 1], [], []>} : vector<2x32xf32>, vector<32x128xf32>, vector<2x128xf32> -> vector<2x128xf32>
    %121 = arith.addf %119, %120 : vector<2x128xf32>
    %122 = arith.negf %121 : vector<2x128xf32>
    %123 = math.exp %122 : vector<2x128xf32>
    %cst_42 = arith.constant 1.000000e+00 : f32
    %124 = vector.broadcast %cst_42 : f32 to vector<2x128xf32>
    %125 = arith.addf %124, %123 : vector<2x128xf32>
    %126 = arith.divf %124, %125 : vector<2x128xf32>
    %127 = math.tanh %121 : vector<2x128xf32>
    %128 = vector.extract_strided_slice %126 {offsets = [0, 32], sizes = [2, 32], strides = [1, 1]} : vector<2x128xf32> to vector<2x32xf32>
    %129 = arith.mulf %128, %115 : vector<2x32xf32>
    %130 = vector.extract_strided_slice %126 {offsets = [0, 0], sizes = [2, 32], strides = [1, 1]} : vector<2x128xf32> to vector<2x32xf32>
    %131 = vector.extract_strided_slice %127 {offsets = [0, 64], sizes = [2, 32], strides = [1, 1]} : vector<2x128xf32> to vector<2x32xf32>
    %132 = arith.mulf %130, %131 : vector<2x32xf32>
    %133 = arith.addf %129, %132 : vector<2x32xf32>
    %134 = vector.extract_strided_slice %126 {offsets = [0, 96], sizes = [2, 32], strides = [1, 1]} : vector<2x128xf32> to vector<2x32xf32>
    %135 = math.tanh %133 : vector<2x32xf32>
    %136 = arith.mulf %134, %135 : vector<2x32xf32>
    %137 = vector.extract_strided_slice %99 {offsets = [4, 0], sizes = [2, 128], strides = [1, 1]} : vector<16x128xf32> to vector<2x128xf32>
    %cst_43 = arith.constant dense<0.000000e+00> : vector<2x128xf32>
    %138 = tpu.matmul %136, %100, %cst_43 {dimension_numbers = #tpu.dot_dimension_numbers<[1], [0], [0], [1], [0, 0, 1, 1], [], []>} : vector<2x32xf32>, vector<32x128xf32>, vector<2x128xf32> -> vector<2x128xf32>
    %139 = arith.addf %137, %138 : vector<2x128xf32>
    %140 = arith.negf %139 : vector<2x128xf32>
    %141 = math.exp %140 : vector<2x128xf32>
    %cst_44 = arith.constant 1.000000e+00 : f32
    %142 = vector.broadcast %cst_44 : f32 to vector<2x128xf32>
    %143 = arith.addf %142, %141 : vector<2x128xf32>
    %144 = arith.divf %142, %143 : vector<2x128xf32>
    %145 = math.tanh %139 : vector<2x128xf32>
    %146 = vector.extract_strided_slice %144 {offsets = [0, 32], sizes = [2, 32], strides = [1, 1]} : vector<2x128xf32> to vector<2x32xf32>
    %147 = arith.mulf %146, %133 : vector<2x32xf32>
    %148 = vector.extract_strided_slice %144 {offsets = [0, 0], sizes = [2, 32], strides = [1, 1]} : vector<2x128xf32> to vector<2x32xf32>
    %149 = vector.extract_strided_slice %145 {offsets = [0, 64], sizes = [2, 32], strides = [1, 1]} : vector<2x128xf32> to vector<2x32xf32>
    %150 = arith.mulf %148, %149 : vector<2x32xf32>
    %151 = arith.addf %147, %150 : vector<2x32xf32>
    %152 = vector.extract_strided_slice %144 {offsets = [0, 96], sizes = [2, 32], strides = [1, 1]} : vector<2x128xf32> to vector<2x32xf32>
    %153 = math.tanh %151 : vector<2x32xf32>
    %154 = arith.mulf %152, %153 : vector<2x32xf32>
    %155 = vector.extract_strided_slice %99 {offsets = [6, 0], sizes = [2, 128], strides = [1, 1]} : vector<16x128xf32> to vector<2x128xf32>
    %cst_45 = arith.constant dense<0.000000e+00> : vector<2x128xf32>
    %156 = tpu.matmul %154, %100, %cst_45 {dimension_numbers = #tpu.dot_dimension_numbers<[1], [0], [0], [1], [0, 0, 1, 1], [], []>} : vector<2x32xf32>, vector<32x128xf32>, vector<2x128xf32> -> vector<2x128xf32>
    %157 = arith.addf %155, %156 : vector<2x128xf32>
    %158 = arith.negf %157 : vector<2x128xf32>
    %159 = math.exp %158 : vector<2x128xf32>
    %cst_46 = arith.constant 1.000000e+00 : f32
    %160 = vector.broadcast %cst_46 : f32 to vector<2x128xf32>
    %161 = arith.addf %160, %159 : vector<2x128xf32>
    %162 = arith.divf %160, %161 : vector<2x128xf32>
    %163 = math.tanh %157 : vector<2x128xf32>
    %164 = vector.extract_strided_slice %162 {offsets = [0, 32], sizes = [2, 32], strides = [1, 1]} : vector<2x128xf32> to vector<2x32xf32>
    %165 = arith.mulf %164, %151 : vector<2x32xf32>
    %166 = vector.extract_strided_slice %162 {offsets = [0, 0], sizes = [2, 32], strides = [1, 1]} : vector<2x128xf32> to vector<2x32xf32>
    %167 = vector.extract_strided_slice %163 {offsets = [0, 64], sizes = [2, 32], strides = [1, 1]} : vector<2x128xf32> to vector<2x32xf32>
    %168 = arith.mulf %166, %167 : vector<2x32xf32>
    %169 = arith.addf %165, %168 : vector<2x32xf32>
    %170 = vector.extract_strided_slice %162 {offsets = [0, 96], sizes = [2, 32], strides = [1, 1]} : vector<2x128xf32> to vector<2x32xf32>
    %171 = math.tanh %169 : vector<2x32xf32>
    %172 = arith.mulf %170, %171 : vector<2x32xf32>
    %173 = vector.extract_strided_slice %99 {offsets = [8, 0], sizes = [2, 128], strides = [1, 1]} : vector<16x128xf32> to vector<2x128xf32>
    %cst_47 = arith.constant dense<0.000000e+00> : vector<2x128xf32>
    %174 = tpu.matmul %172, %100, %cst_47 {dimension_numbers = #tpu.dot_dimension_numbers<[1], [0], [0], [1], [0, 0, 1, 1], [], []>} : vector<2x32xf32>, vector<32x128xf32>, vector<2x128xf32> -> vector<2x128xf32>
    %175 = arith.addf %173, %174 : vector<2x128xf32>
    %176 = arith.negf %175 : vector<2x128xf32>
    %177 = math.exp %176 : vector<2x128xf32>
    %cst_48 = arith.constant 1.000000e+00 : f32
    %178 = vector.broadcast %cst_48 : f32 to vector<2x128xf32>
    %179 = arith.addf %178, %177 : vector<2x128xf32>
    %180 = arith.divf %178, %179 : vector<2x128xf32>
    %181 = math.tanh %175 : vector<2x128xf32>
    %182 = vector.extract_strided_slice %180 {offsets = [0, 32], sizes = [2, 32], strides = [1, 1]} : vector<2x128xf32> to vector<2x32xf32>
    %183 = arith.mulf %182, %169 : vector<2x32xf32>
    %184 = vector.extract_strided_slice %180 {offsets = [0, 0], sizes = [2, 32], strides = [1, 1]} : vector<2x128xf32> to vector<2x32xf32>
    %185 = vector.extract_strided_slice %181 {offsets = [0, 64], sizes = [2, 32], strides = [1, 1]} : vector<2x128xf32> to vector<2x32xf32>
    %186 = arith.mulf %184, %185 : vector<2x32xf32>
    %187 = arith.addf %183, %186 : vector<2x32xf32>
    %188 = vector.extract_strided_slice %180 {offsets = [0, 96], sizes = [2, 32], strides = [1, 1]} : vector<2x128xf32> to vector<2x32xf32>
    %189 = math.tanh %187 : vector<2x32xf32>
    %190 = arith.mulf %188, %189 : vector<2x32xf32>
    %191 = vector.extract_strided_slice %99 {offsets = [10, 0], sizes = [2, 128], strides = [1, 1]} : vector<16x128xf32> to vector<2x128xf32>
    %cst_49 = arith.constant dense<0.000000e+00> : vector<2x128xf32>
    %192 = tpu.matmul %190, %100, %cst_49 {dimension_numbers = #tpu.dot_dimension_numbers<[1], [0], [0], [1], [0, 0, 1, 1], [], []>} : vector<2x32xf32>, vector<32x128xf32>, vector<2x128xf32> -> vector<2x128xf32>
    %193 = arith.addf %191, %192 : vector<2x128xf32>
    %194 = arith.negf %193 : vector<2x128xf32>
    %195 = math.exp %194 : vector<2x128xf32>
    %cst_50 = arith.constant 1.000000e+00 : f32
    %196 = vector.broadcast %cst_50 : f32 to vector<2x128xf32>
    %197 = arith.addf %196, %195 : vector<2x128xf32>
    %198 = arith.divf %196, %197 : vector<2x128xf32>
    %199 = math.tanh %193 : vector<2x128xf32>
    %200 = vector.extract_strided_slice %198 {offsets = [0, 32], sizes = [2, 32], strides = [1, 1]} : vector<2x128xf32> to vector<2x32xf32>
    %201 = arith.mulf %200, %187 : vector<2x32xf32>
    %202 = vector.extract_strided_slice %198 {offsets = [0, 0], sizes = [2, 32], strides = [1, 1]} : vector<2x128xf32> to vector<2x32xf32>
    %203 = vector.extract_strided_slice %199 {offsets = [0, 64], sizes = [2, 32], strides = [1, 1]} : vector<2x128xf32> to vector<2x32xf32>
    %204 = arith.mulf %202, %203 : vector<2x32xf32>
    %205 = arith.addf %201, %204 : vector<2x32xf32>
    %206 = vector.extract_strided_slice %198 {offsets = [0, 96], sizes = [2, 32], strides = [1, 1]} : vector<2x128xf32> to vector<2x32xf32>
    %207 = math.tanh %205 : vector<2x32xf32>
    %208 = arith.mulf %206, %207 : vector<2x32xf32>
    %209 = vector.extract_strided_slice %99 {offsets = [12, 0], sizes = [2, 128], strides = [1, 1]} : vector<16x128xf32> to vector<2x128xf32>
    %cst_51 = arith.constant dense<0.000000e+00> : vector<2x128xf32>
    %210 = tpu.matmul %208, %100, %cst_51 {dimension_numbers = #tpu.dot_dimension_numbers<[1], [0], [0], [1], [0, 0, 1, 1], [], []>} : vector<2x32xf32>, vector<32x128xf32>, vector<2x128xf32> -> vector<2x128xf32>
    %211 = arith.addf %209, %210 : vector<2x128xf32>
    %212 = arith.negf %211 : vector<2x128xf32>
    %213 = math.exp %212 : vector<2x128xf32>
    %cst_52 = arith.constant 1.000000e+00 : f32
    %214 = vector.broadcast %cst_52 : f32 to vector<2x128xf32>
    %215 = arith.addf %214, %213 : vector<2x128xf32>
    %216 = arith.divf %214, %215 : vector<2x128xf32>
    %217 = math.tanh %211 : vector<2x128xf32>
    %218 = vector.extract_strided_slice %216 {offsets = [0, 32], sizes = [2, 32], strides = [1, 1]} : vector<2x128xf32> to vector<2x32xf32>
    %219 = arith.mulf %218, %205 : vector<2x32xf32>
    %220 = vector.extract_strided_slice %216 {offsets = [0, 0], sizes = [2, 32], strides = [1, 1]} : vector<2x128xf32> to vector<2x32xf32>
    %221 = vector.extract_strided_slice %217 {offsets = [0, 64], sizes = [2, 32], strides = [1, 1]} : vector<2x128xf32> to vector<2x32xf32>
    %222 = arith.mulf %220, %221 : vector<2x32xf32>
    %223 = arith.addf %219, %222 : vector<2x32xf32>
    %224 = vector.extract_strided_slice %216 {offsets = [0, 96], sizes = [2, 32], strides = [1, 1]} : vector<2x128xf32> to vector<2x32xf32>
    %225 = math.tanh %223 : vector<2x32xf32>
    %226 = arith.mulf %224, %225 : vector<2x32xf32>
    %227 = vector.extract_strided_slice %99 {offsets = [14, 0], sizes = [2, 128], strides = [1, 1]} : vector<16x128xf32> to vector<2x128xf32>
    %cst_53 = arith.constant dense<0.000000e+00> : vector<2x128xf32>
    %228 = tpu.matmul %226, %100, %cst_53 {dimension_numbers = #tpu.dot_dimension_numbers<[1], [0], [0], [1], [0, 0, 1, 1], [], []>} : vector<2x32xf32>, vector<32x128xf32>, vector<2x128xf32> -> vector<2x128xf32>
    %229 = arith.addf %227, %228 : vector<2x128xf32>
    %230 = arith.negf %229 : vector<2x128xf32>
    %231 = math.exp %230 : vector<2x128xf32>
    %cst_54 = arith.constant 1.000000e+00 : f32
    %232 = vector.broadcast %cst_54 : f32 to vector<2x128xf32>
    %233 = arith.addf %232, %231 : vector<2x128xf32>
    %234 = arith.divf %232, %233 : vector<2x128xf32>
    %235 = math.tanh %229 : vector<2x128xf32>
    %236 = vector.extract_strided_slice %234 {offsets = [0, 32], sizes = [2, 32], strides = [1, 1]} : vector<2x128xf32> to vector<2x32xf32>
    %237 = arith.mulf %236, %223 : vector<2x32xf32>
    %238 = vector.extract_strided_slice %234 {offsets = [0, 0], sizes = [2, 32], strides = [1, 1]} : vector<2x128xf32> to vector<2x32xf32>
    %239 = vector.extract_strided_slice %235 {offsets = [0, 64], sizes = [2, 32], strides = [1, 1]} : vector<2x128xf32> to vector<2x32xf32>
    %240 = arith.mulf %238, %239 : vector<2x32xf32>
    %241 = arith.addf %237, %240 : vector<2x32xf32>
    %242 = vector.extract_strided_slice %234 {offsets = [0, 96], sizes = [2, 32], strides = [1, 1]} : vector<2x128xf32> to vector<2x32xf32>
    %243 = math.tanh %241 : vector<2x32xf32>
    %244 = arith.mulf %242, %243 : vector<2x32xf32>
    %c0_55 = arith.constant 0 : index
    %c0_56 = arith.constant 0 : index
    %245 = vector.load %arg2[%c0_55, %c0_56] : memref<8x32xf32, #tpu.memory_space<vmem>>, vector<8x32xf32>
    %c0_57 = arith.constant 0 : index
    %c384 = arith.constant 384 : index
    %246 = vector.load %arg5[%c0_57, %c384] : memref<32x640xf32, #tpu.memory_space<vmem>>, vector<32x128xf32>
    %cst_58 = arith.constant dense<0.000000e+00> : vector<8x128xf32>
    %247 = tpu.matmul %245, %246, %cst_58 {dimension_numbers = #tpu.dot_dimension_numbers<[1], [0], [0], [1], [0, 0, 1, 1], [], []>} : vector<8x32xf32>, vector<32x128xf32>, vector<8x128xf32> -> vector<8x128xf32>
    %c119 = arith.constant 119 : index
    %c0_59 = arith.constant 0 : index
    %248 = vector.load %arg3[%c119, %c0_59] : memref<128x128xf32, #tpu.memory_space<vmem>>, vector<1x128xf32>
    %249 = vector.broadcast %248 : vector<1x128xf32> to vector<8x128xf32>
    %250 = arith.addf %247, %249 : vector<8x128xf32>
    %c0_60 = arith.constant 0 : index
    %c512 = arith.constant 512 : index
    %251 = vector.load %arg5[%c0_60, %c512] : memref<32x640xf32, #tpu.memory_space<vmem>>, vector<32x128xf32>
    %252 = vector.extract_strided_slice %250 {offsets = [0, 0], sizes = [2, 128], strides = [1, 1]} : vector<8x128xf32> to vector<2x128xf32>
    %cst_61 = arith.constant dense<0.000000e+00> : vector<2x128xf32>
    %253 = tpu.matmul %244, %251, %cst_61 {dimension_numbers = #tpu.dot_dimension_numbers<[1], [0], [0], [1], [0, 0, 1, 1], [], []>} : vector<2x32xf32>, vector<32x128xf32>, vector<2x128xf32> -> vector<2x128xf32>
    %254 = arith.addf %252, %253 : vector<2x128xf32>
    %255 = arith.negf %254 : vector<2x128xf32>
    %256 = math.exp %255 : vector<2x128xf32>
    %cst_62 = arith.constant 1.000000e+00 : f32
    %257 = vector.broadcast %cst_62 : f32 to vector<2x128xf32>
    %258 = arith.addf %257, %256 : vector<2x128xf32>
    %259 = arith.divf %257, %258 : vector<2x128xf32>
    %260 = math.tanh %254 : vector<2x128xf32>
    %261 = vector.extract_strided_slice %259 {offsets = [0, 32], sizes = [2, 32], strides = [1, 1]} : vector<2x128xf32> to vector<2x32xf32>
    %262 = arith.mulf %261, %241 : vector<2x32xf32>
    %263 = vector.extract_strided_slice %259 {offsets = [0, 0], sizes = [2, 32], strides = [1, 1]} : vector<2x128xf32> to vector<2x32xf32>
    %264 = vector.extract_strided_slice %260 {offsets = [0, 64], sizes = [2, 32], strides = [1, 1]} : vector<2x128xf32> to vector<2x32xf32>
    %265 = arith.mulf %263, %264 : vector<2x32xf32>
    %266 = arith.addf %262, %265 : vector<2x32xf32>
    %267 = vector.extract_strided_slice %259 {offsets = [0, 96], sizes = [2, 32], strides = [1, 1]} : vector<2x128xf32> to vector<2x32xf32>
    %268 = math.tanh %266 : vector<2x32xf32>
    %269 = arith.mulf %267, %268 : vector<2x32xf32>
    %270 = vector.extract_strided_slice %250 {offsets = [2, 0], sizes = [2, 128], strides = [1, 1]} : vector<8x128xf32> to vector<2x128xf32>
    %cst_63 = arith.constant dense<0.000000e+00> : vector<2x128xf32>
    %271 = tpu.matmul %269, %251, %cst_63 {dimension_numbers = #tpu.dot_dimension_numbers<[1], [0], [0], [1], [0, 0, 1, 1], [], []>} : vector<2x32xf32>, vector<32x128xf32>, vector<2x128xf32> -> vector<2x128xf32>
    %272 = arith.addf %270, %271 : vector<2x128xf32>
    %273 = arith.negf %272 : vector<2x128xf32>
    %274 = math.exp %273 : vector<2x128xf32>
    %cst_64 = arith.constant 1.000000e+00 : f32
    %275 = vector.broadcast %cst_64 : f32 to vector<2x128xf32>
    %276 = arith.addf %275, %274 : vector<2x128xf32>
    %277 = arith.divf %275, %276 : vector<2x128xf32>
    %278 = math.tanh %272 : vector<2x128xf32>
    %279 = vector.extract_strided_slice %277 {offsets = [0, 32], sizes = [2, 32], strides = [1, 1]} : vector<2x128xf32> to vector<2x32xf32>
    %280 = arith.mulf %279, %266 : vector<2x32xf32>
    %281 = vector.extract_strided_slice %277 {offsets = [0, 0], sizes = [2, 32], strides = [1, 1]} : vector<2x128xf32> to vector<2x32xf32>
    %282 = vector.extract_strided_slice %278 {offsets = [0, 64], sizes = [2, 32], strides = [1, 1]} : vector<2x128xf32> to vector<2x32xf32>
    %283 = arith.mulf %281, %282 : vector<2x32xf32>
    %284 = arith.addf %280, %283 : vector<2x32xf32>
    %285 = vector.extract_strided_slice %277 {offsets = [0, 96], sizes = [2, 32], strides = [1, 1]} : vector<2x128xf32> to vector<2x32xf32>
    %286 = math.tanh %284 : vector<2x32xf32>
    %287 = arith.mulf %285, %286 : vector<2x32xf32>
    %288 = vector.extract_strided_slice %250 {offsets = [4, 0], sizes = [2, 128], strides = [1, 1]} : vector<8x128xf32> to vector<2x128xf32>
    %cst_65 = arith.constant dense<0.000000e+00> : vector<2x128xf32>
    %289 = tpu.matmul %287, %251, %cst_65 {dimension_numbers = #tpu.dot_dimension_numbers<[1], [0], [0], [1], [0, 0, 1, 1], [], []>} : vector<2x32xf32>, vector<32x128xf32>, vector<2x128xf32> -> vector<2x128xf32>
    %290 = arith.addf %288, %289 : vector<2x128xf32>
    %291 = arith.negf %290 : vector<2x128xf32>
    %292 = math.exp %291 : vector<2x128xf32>
    %cst_66 = arith.constant 1.000000e+00 : f32
    %293 = vector.broadcast %cst_66 : f32 to vector<2x128xf32>
    %294 = arith.addf %293, %292 : vector<2x128xf32>
    %295 = arith.divf %293, %294 : vector<2x128xf32>
    %296 = math.tanh %290 : vector<2x128xf32>
    %297 = vector.extract_strided_slice %295 {offsets = [0, 32], sizes = [2, 32], strides = [1, 1]} : vector<2x128xf32> to vector<2x32xf32>
    %298 = arith.mulf %297, %284 : vector<2x32xf32>
    %299 = vector.extract_strided_slice %295 {offsets = [0, 0], sizes = [2, 32], strides = [1, 1]} : vector<2x128xf32> to vector<2x32xf32>
    %300 = vector.extract_strided_slice %296 {offsets = [0, 64], sizes = [2, 32], strides = [1, 1]} : vector<2x128xf32> to vector<2x32xf32>
    %301 = arith.mulf %299, %300 : vector<2x32xf32>
    %302 = arith.addf %298, %301 : vector<2x32xf32>
    %303 = vector.extract_strided_slice %295 {offsets = [0, 96], sizes = [2, 32], strides = [1, 1]} : vector<2x128xf32> to vector<2x32xf32>
    %304 = math.tanh %302 : vector<2x32xf32>
    %305 = arith.mulf %303, %304 : vector<2x32xf32>
    %306 = vector.extract_strided_slice %250 {offsets = [6, 0], sizes = [2, 128], strides = [1, 1]} : vector<8x128xf32> to vector<2x128xf32>
    %cst_67 = arith.constant dense<0.000000e+00> : vector<2x128xf32>
    %307 = tpu.matmul %305, %251, %cst_67 {dimension_numbers = #tpu.dot_dimension_numbers<[1], [0], [0], [1], [0, 0, 1, 1], [], []>} : vector<2x32xf32>, vector<32x128xf32>, vector<2x128xf32> -> vector<2x128xf32>
    %308 = arith.addf %306, %307 : vector<2x128xf32>
    %309 = arith.negf %308 : vector<2x128xf32>
    %310 = math.exp %309 : vector<2x128xf32>
    %cst_68 = arith.constant 1.000000e+00 : f32
    %311 = vector.broadcast %cst_68 : f32 to vector<2x128xf32>
    %312 = arith.addf %311, %310 : vector<2x128xf32>
    %313 = arith.divf %311, %312 : vector<2x128xf32>
    %314 = math.tanh %308 : vector<2x128xf32>
    %315 = vector.extract_strided_slice %313 {offsets = [0, 32], sizes = [2, 32], strides = [1, 1]} : vector<2x128xf32> to vector<2x32xf32>
    %316 = arith.mulf %315, %302 : vector<2x32xf32>
    %317 = vector.extract_strided_slice %313 {offsets = [0, 0], sizes = [2, 32], strides = [1, 1]} : vector<2x128xf32> to vector<2x32xf32>
    %318 = vector.extract_strided_slice %314 {offsets = [0, 64], sizes = [2, 32], strides = [1, 1]} : vector<2x128xf32> to vector<2x32xf32>
    %319 = arith.mulf %317, %318 : vector<2x32xf32>
    %320 = arith.addf %316, %319 : vector<2x32xf32>
    %321 = vector.extract_strided_slice %313 {offsets = [0, 96], sizes = [2, 32], strides = [1, 1]} : vector<2x128xf32> to vector<2x32xf32>
    %322 = math.tanh %320 : vector<2x32xf32>
    %323 = arith.mulf %321, %322 : vector<2x32xf32>
    %324 = tpu.concatenate %269, %287, %305, %323 in 0 : vector<2x32xf32>, vector<2x32xf32>, vector<2x32xf32>, vector<2x32xf32> -> vector<8x32xf32>
    %c120 = arith.constant 120 : index
    %c0_69 = arith.constant 0 : index
    %325 = vector.load %arg3[%c120, %c0_69] : memref<128x128xf32, #tpu.memory_space<vmem>>, vector<1x32xf32>
    %326 = vector.broadcast %325 : vector<1x32xf32> to vector<8x32xf32>
    %327 = arith.mulf %324, %326 : vector<8x32xf32>
    %cst_70 = arith.constant dense<0.000000e+00> : vector<8xf32>
    %328 = vector.multi_reduction <add>, %327, %cst_70 [1] : vector<8x32xf32> to vector<8xf32>
    %329 = vector.shape_cast %328 : vector<8xf32> to vector<8x1xf32>
    %c121 = arith.constant 121 : index
    %c0_71 = arith.constant 0 : index
    %330 = vector.load %arg3[%c121, %c0_71] : memref<128x128xf32, #tpu.memory_space<vmem>>, vector<1x1xf32>
    %331 = vector.broadcast %330 : vector<1x1xf32> to vector<8x1xf32>
    %332 = arith.addf %329, %331 : vector<8x1xf32>
    %cst_72 = arith.constant 0.000000e+00 : f32
    %333 = vector.broadcast %cst_72 : f32 to vector<4x32xf32>
    %334 = tpu.concatenate %323, %320, %333 in 0 : vector<2x32xf32>, vector<2x32xf32>, vector<4x32xf32> -> vector<8x32xf32>
    %cst_73 = arith.constant 0.000000e+00 : f32
    %335 = vector.broadcast %cst_73 : f32 to vector<8x95xf32>
    %336 = tpu.concatenate %332, %334, %335 in 1 : vector<8x1xf32>, vector<8x32xf32>, vector<8x95xf32> -> vector<8x128xf32>
    %c0_74 = arith.constant 0 : index
    %c0_75 = arith.constant 0 : index
    %337 = vector.load %arg6[%c0_74, %c0_75] : memref<8x128xf32, #tpu.memory_space<vmem>>, vector<8x128xf32>
    tpu.vector_store %arg6[%c0_74, %c0_75], %336 {strides = array<i32>} : memref<8x128xf32, #tpu.memory_space<vmem>>, vector<8x128xf32>,
    return
  }
}

</mosaic_0001>

<bundles_post_ra>
// kernel: net_forward.1
= control target key start
LH: loop header
LB: loop body
LE: loop exit
PB: predicated region body
PF: predicated region fallthrough
CT: control target
= control target key end

     0   :  { %11 = vsyncpa [#allocation3], 0  ;;  %s2959_s0 = inlined_call_operand.vmem [shape: f32[2,16], index: 0, kind: input, shape index: {}]   ;;  %s2960_s1 = inlined_call_operand.vmem [shape: f32[16,40], index: 1, kind: input, shape index: {}]   ;;  %s2961_s2 = inlined_call_operand.vmem [shape: f32[8,32], index: 2, kind: input, shape index: {}]   ;;  %s2962_s3 = inlined_call_operand.hbm [shape: f32[128,128], index: 3, kind: input, shape index: {}]   ;;  %s2963_s4 = inlined_call_operand.hbm [shape: f32[56,192], index: 4, kind: input, shape index: {}]   ;;  %s2964_s5 = inlined_call_operand.vmem [shape: f32[32,640], index: 5, kind: input, shape index: {}]   ;;  %s2965_s6 = inlined_call_operand.vmem [shape: f32[8,128], index: 6, kind: output, shape index: {}]  }
   0x1   :  { %12 = vsyncpa [#allocation5], 0  ;;  %s2537_s21 = smov [#allocation2]  }
   0x2   :  { %s24_s22 = sshll.u32 %s2537_s21, 4  ;;  %s25_s22 = int_to_ptr.vmem [resolvable:$true] %s24_s22 }
   0x3   :  { %s2501_s23 = scalar_lea.vmem %s25_s22, 2048  ;;  %p2506_p1 = scmp.lt.s32.totalorder %s25_s22, %s25_s22 }
   0x4   :  { %p2502_p0 = scmp.ne.s32.totalorder %s25_s22, %s2501_s23  ;;  %p2507_p2 = scmp.lt.s32.totalorder %s2501_s23, %s2501_s23 }
   0x6   :  { %p2508_p3 = por %p2507_p2, %p2506_p1 }
   0x8   :  { %p2509_p4 = pnand %p2508_p3, %p2502_p0 }
   0xa   :  { %2512 = shalt.err (!%p2509_p4)
}
   0xb   :  { %s2538_s24 = smov 128   ;;  %s2539_s25 = smov 8  }
   0xc   :  { %30 = dma.hbm_to_vmem [thread:$0]  %s2962_s3, 2048, %s25_s22, [#allocation3], %s2538_s24, %s2538_s24, %s2539_s25  }
   0xd   :  { %s2540_s28 = smov [#allocation4]  }
   0xe   :  { %s36_s29 = sshll.u32 %s2540_s28, 4  ;;  %s37_s29 = int_to_ptr.vmem [resolvable:$true] %s36_s29 }
   0xf   :  { %s2521_s30 = scalar_lea.vmem %s37_s29, 1792  ;;  %p2526_p6 = scmp.lt.s32.totalorder %s37_s29, %s37_s29 }
  0x10   :  { %p2522_p5 = scmp.ne.s32.totalorder %s37_s29, %s2521_s30  ;;  %p2527_p7 = scmp.lt.s32.totalorder %s2521_s30, %s2521_s30 }
  0x12   :  { %p2528_p8 = por %p2527_p7, %p2526_p6 }
  0x14   :  { %p2529_p9 = pnand %p2528_p8, %p2522_p5 }
  0x16   :  { %2532 = shalt.err (!%p2529_p9)
}
  0x17   :  { %s2541_s7 = smov 256   ;;  %s2542_s8 = smov 16  }
  0x18   :  { %42 = dma.hbm_to_vmem [thread:$0]  %s2963_s4, 1792, %s37_s29, [#allocation5], %s2541_s7, %s2541_s7, %s2542_s8  }
  0x19   :  { %2533 = dma.done.wait [#allocation3], 2048  }
  0x1a   :  { %2534 = vsyncadd [#allocation3], 4294965248 }
  0x1b   :  { %2535 = dma.done.wait [#allocation5], 1792  }
  0x1c   :  { %2536 = vsyncadd [#allocation5], 4294965504  ;;  %v2543_v0 = vmov 0.0   ;;  %vm2544_vm0 = vmmov 0   ;;  %v53_v1 = vld [vmem:[#allocation2 + $0x8] sm:$0xff]  ;;  %v52_v2 = vld [vmem:[#allocation2] sm:$0xff] }
  0x1d   :  { %2174 = vmatprep.subr.mxu0 %v2543_v0  ;;  %2178 = vmatprep.mubr.msk.f32.mxu0 %vm2544_vm0, %v2543_v0  ;;  %v51_v3 = vld [vmem:[%s2959_s0] sm:$0x3]  ;;  %vm54_vm1 = vcmask 130048   ;;  %vm130_vm2 = vcmask 254976   ;;  %v159_v12 = vld [vmem:[%s2964_s5 + $0x78] sm:$0xff]  ;;  %v158_v13 = vld [vmem:[%s2964_s5 + $0x50] sm:$0xff] }
  0x1e   :  { %2181 = vmatprep.subr.mxu1 %v2543_v0  ;;  %2189 = vmatprep.mubr.msk.f32.mxu1 %vm2544_vm0, %v2543_v0  ;;  %v157_v14 = vld [vmem:[%s2964_s5 + $0x28] sm:$0xff]  ;;  %v156_v15 = vld [vmem:[%s2964_s5] sm:$0xff]  ;;  %v2041_v21 = vld [vmem:[#allocation2 + $0x70] ss:$0 sm:$0xff]  ;;  %vm165_vm3 = vcmask 261120   ;;  %vm370_vm4 = vcmask 326656  }
  0x1f   :  { %2175 = vmatpush3.msra.mxu0 %v53_v1  ;;  %2182 = vmatpush3.msra.mxu1 %v159_v12  ;;  %v369_v16 = vld [vmem:[#allocation4 + $0x48] sm:$0xff]  ;;  %v2042_v23 = vld [vmem:[#allocation2 + $0x71] ss:$0 sm:$0xff]  ;;  %v368_v27 = vld [vmem:[#allocation4 + $0x40] sm:$0xff]  ;;  %vm241_vm5 = vcmask 779264   ;;  %s2545_s22 = smov 32  }
  0x20   :  { %2176 = vmatprep.subr.mxu0 %v2543_v0  ;;  %2183 = vmatprep.subr.mxu1 %v2543_v0  ;;  %v367_v28 = vld [vmem:[#allocation4 + $0x38] sm:$0xff]  ;;  %v366_v29 = vld [vmem:[#allocation4 + $0x30] sm:$0xff]  ;;  %v365_v30 = vld [vmem:[#allocation4 + $0x28] sm:$0xff]  ;;  %s2547_s23 = smov 64   ;;  %vm502_vm6 = vcmask 523520   ;;  %vm284_vm7 = vcmask 785408  }
  0x21   :  { %2177 = vmatpush3.msra.mxu0 %v52_v2  ;;  %2184 = vmatpush3.msra.mxu1 %v158_v13  ;;  %v364_v31 = vld [vmem:[#allocation4 + $0x20] sm:$0xff]  ;;  %v363_v32 = vld [vmem:[#allocation4 + $0x18] sm:$0xff]  ;;  %v362_v33 = vld [vmem:[#allocation4 + $0x10] sm:$0xff]  ;;  %vm1986_vm8 = vcmask 1041408   ;;  %vm1988_vm9 = vcmask 1043456   ;;  %vm1990_vm10 = vcmask 1045504  }
  0x22   :  { %2179 = vmatmul.mubr.msk.f32.vlgmr.msra.gmra.mxu0 %vm54_vm1, %v51_v3  ;;  %2192 = vmatprep.subr.mxu0 %v2543_v0  ;;  %v361_v34 = vld [vmem:[#allocation4 + $0x8] sm:$0xff]  ;;  %v360_v35 = vld [vmem:[#allocation4] sm:$0xff]  ;;  %v2043_v38 = vld [vmem:[#allocation2 + $0x72] ss:$0 sm:$0xff]  ;;  %vm2029_vm11 = vcmask 7168   ;;  %vm2031_vm12 = vcmask 269312  }
  0x23   :  { %2216 = vmatprep.mubr.msk.f32.mxu0 %vm2544_vm0, %v2543_v0  ;;  %2185 = vmatprep.subr.mxu1 %v2543_v0  ;;  %v358_v36 = vld [vmem:[%s2960_s1] sm:$0xff]  ;;  %v359_v37 = vld [vmem:[%s2960_s1 + $0x8] sm:$0xff]  ;;  %v454_v43 = vld [vmem:[#allocation4 + $0x50] sm:$0xff]  ;;  %s2546_s1 = smov 96  }
  0x24   :  { %2186 = vmatpush3.msra.mxu1 %v157_v14  ;;  %v456_v47 = vld [vmem:[#allocation4 + $0x60] sm:$0xff]  ;;  %v455_v50 = vld [vmem:[#allocation4 + $0x58] sm:$0xff]  ;;  %v457_v53 = vld [vmem:[#allocation4 + $0x68] sm:$0xff] }
  0x25   :  { %2187 = vmatprep.subr.mxu1 %v2543_v0 }
  0x26   :  { %2188 = vmatpush3.msra.mxu1 %v156_v15 }
  0x27   :  { %399 = vmatprep.subr.mxu1 %v369_v16 }
  0xe2   :  { %v124_v4 = vpop.f32.mrf.mxu0 }
  0xe3   :  { %v131_v5 = vsel %vm130_vm2, %v124_v4, 0.0 }
  0xe4   :  { %132 = vadd.xlane.f32.xlu0 %v131_v5  ;;  %v2180_v6 = vpop.f32.mrf.mxu0 }
 0x16d   :  { %v133_v7 = vpop.xlane.xlu0 %132 }
 0x16e   :  { %v135_v8 = vmul.f32 0.03125, %v133_v7 }
 0x170   :  { %v136_v9 = vsub.f32 %v124_v4, %v135_v8 }
 0x172   :  { %v137_v10 = vmul.f32 %v136_v9, %v136_v9 }
 0x174   :  { %v138_v11 = vsel %vm130_vm2, %v137_v10, 0.0 }
 0x175   :  { %139 = vadd.xlane.f32.xlu0 %v138_v11 }
 0x1fe   :  { %v140_v17 = vpop.xlane.xlu0 %139 }
 0x1ff   :  { %v141_v18 = vmul.f32 0.03125, %v140_v17 }
 0x201   :  { %v142_v19 = vadd.f32 1e-05, %v141_v18 }
 0x203   :  { %2385 = vrsqrt.f32 %v142_v19  ;;  %v278_v19 = vld [vmem:[#allocation2 + $0x68] sm:$0xff] }
 0x204   :  { %2193 = vmatpush3.msra.mxu0 %v278_v19 }
 0x205   :  { %2194 = vmatprep.subr.mxu0 %v2543_v0 }
 0x210   :  { %v2386_v20 = vpop.eup %2385 }
 0x211   :  { %v144_v22 = vmul.f32 %v2386_v20, %v136_v9  ;;  %v277_v20 = vld [vmem:[#allocation2 + $0x60] sm:$0xff] }
 0x212   :  { %2195 = vmatpush3.msra.mxu0 %v277_v20 }
 0x213   :  { %v149_v24 = vmul.f32 %v2041_v21, %v144_v22  ;;  %2196 = vmatprep.subr.mxu0 %v2543_v0  ;;  %v276_v21 = vld [vmem:[#allocation2 + $0x58] sm:$0xff]  ;;  %v275_v22 = vld [vmem:[#allocation2 + $0x50] sm:$0xff] }
 0x214   :  { %2197 = vmatpush3.msra.mxu0 %v276_v21 }
 0x215   :  { %v154_v25 = vadd.f32 %v2042_v23, %v149_v24  ;;  %2198 = vmatprep.subr.mxu0 %v2543_v0  ;;  %v274_v23 = vld [vmem:[#allocation2 + $0x48] sm:$0xff]  ;;  %v273_v24 = vld [vmem:[#allocation2 + $0x40] sm:$0xff] }
 0x216   :  { %2199 = vmatpush3.msra.mxu0 %v275_v22 }
 0x217   :  { %v155_v26 = vmax.f32 %v154_v25, 0.0  ;;  %2200 = vmatprep.subr.mxu0 %v2543_v0  ;;  %v272_v25 = vld [vmem:[#allocation2 + $0x38] sm:$0xff] }
 0x218   :  { %2201 = vmatpush3.msra.mxu0 %v274_v23 }
 0x219   :  { %2190 = vmatmul.mubr.msk.f32.vlgmr.msra.gmra.mxu1 %vm165_vm3, %v155_v26  ;;  %2202 = vmatprep.subr.mxu0 %v2543_v0  ;;  %v271_v26 = vld [vmem:[#allocation2 + $0x30] sm:$0xff] }
 0x21a   :  { %400 = vmatpush1.msra.mxu1 %v368_v27  ;;  %441 = vmatprep.mubr.f32.mxu1 %v2543_v0  ;;  %v270_v27 = vld [vmem:[#allocation2 + $0x28] sm:$0xff] }
 0x21b   :  { %401 = vmatprep.subr.mxu1 %v367_v28  ;;  %2203 = vmatpush3.msra.mxu0 %v273_v24  ;;  %v269_v28 = vld [vmem:[#allocation2 + $0x20] sm:$0xff] }
 0x21c   :  { %402 = vmatpush1.msra.mxu1 %v366_v29  ;;  %2204 = vmatprep.subr.mxu0 %v2543_v0  ;;  %v268_v29 = vld [vmem:[#allocation2 + $0x18] sm:$0xff] }
 0x21d   :  { %403 = vmatprep.subr.mxu1 %v365_v30  ;;  %2205 = vmatpush3.msra.mxu0 %v272_v25  ;;  %v267_v30 = vld [vmem:[#allocation2 + $0x10] sm:$0xff] }
 0x21e   :  { %404 = vmatpush1.msra.mxu1 %v364_v31  ;;  %2206 = vmatprep.subr.mxu0 %v2543_v0 }
 0x21f   :  { %405 = vmatprep.subr.mxu1 %v363_v32  ;;  %2207 = vmatpush3.msra.mxu0 %v271_v26 }
 0x220   :  { %406 = vmatpush1.msra.mxu1 %v362_v33  ;;  %2208 = vmatprep.subr.mxu0 %v2543_v0 }
 0x221   :  { %407 = vmatprep.subr.mxu1 %v361_v34  ;;  %2209 = vmatpush3.msra.mxu0 %v270_v27 }
 0x222   :  { %408 = vmatpush1.msra.mxu1 %v360_v35  ;;  %2210 = vmatprep.subr.mxu0 %v2543_v0 }
 0x223   :  { %2049 = vmatmul.mubr.msk.f32.vlgmr.msra.gmra.mxu1 %vm370_vm4, %v358_v36  ;;  %2211 = vmatpush3.msra.mxu0 %v269_v28 }
 0x224   :  { %447 = vmatprep.mubr.f32.mxu1 %v2543_v0  ;;  %2212 = vmatprep.subr.mxu0 %v2543_v0 }
 0x225   :  { %2213 = vmatpush3.msra.mxu0 %v268_v29 }
 0x226   :  { %2214 = vmatprep.subr.mxu0 %v2543_v0 }
 0x227   :  { %2050 = vmatmul.mubr.msk.f32.gmra.mxu1 %vm370_vm4, %v359_v37  ;;  %2215 = vmatpush3.msra.mxu0 %v267_v30 }
 0x228   :  { %2241 = vmatprep.subr.mxu0 %v2543_v0 }
 0x2d9   :  { %v235_v39 = vpop.f32.mrf.mxu1 }
 0x2da   :  { %v236_v40 = vadd.f32 %v2043_v38, %v235_v39 }
 0x2db   :  { %v2191_v41 = vpop.f32.mrf.mxu1 }
 0x2dc   :  { %v242_v42 = vsel %vm241_vm5, %v236_v40, 0.0 }
 0x2dd   :  { %243 = vadd.xlane.f32.xlu0 %v242_v42  ;;  %v2045_v42 = vld [vmem:[#allocation2 + $0x73] ss:$0 sm:$0xff] }
 0x2e3   :  { %v443_v44 = vpop.f32.mrf.mxu1 }
 0x2e4   :  { %v458_v45 = vmul.f32 %v454_v43, %v443_v44  ;;  %v2046_v44 = vld [vmem:[#allocation2 + $0x74] ss:$0 sm:$0xff] }
 0x2e5   :  { %v2629_v46 = vpop.f32.mrf.mxu1 }
 0x2e6   :  { %464 = vrot.lane.b32.xlu1 %v458_v45, %s2545_s22  ;;  %v459_v51 = vmul.f32 %v455_v50, %v2629_v46 }
 0x2e7   :  { %v449_v48 = vpop.f32.mrf.mxu1 }
 0x2e8   :  { %v460_v49 = vmul.f32 %v456_v47, %v449_v48 }
 0x2e9   :  { %v2637_v52 = vpop.f32.mrf.mxu1 }
 0x2ea   :  { %474 = vrot.lane.b32.xlu1 %v458_v45, %s2546_s1  ;;  %v461_v54 = vmul.f32 %v457_v53, %v2637_v52 }
 0x2ee   :  { %466 = vrot.lane.b32.xlu1 %v460_v49, %s2545_s22 }
 0x2f2   :  { %482 = vrot.lane.b32.xlu1 %v458_v45, %s2547_s23 }
 0x2f3   :  { %476 = vrot.lane.b32.xlu0 %v460_v49, %s2546_s1 }
 0x2f6   :  { %492 = vrot.lane.b32.xlu1 %v459_v51, %s2545_s22 }
 0x2fa   :  { %484 = vrot.lane.b32.xlu1 %v460_v49, %s2547_s23 }
 0x2fe   :  { %494 = vrot.lane.b32.xlu1 %v461_v54, %s2545_s22 }
 0x358   :  { %v465_v55 = vpop.permute.xlu1 %464 }
 0x359   :  { %v470_v57 = vadd.f32 %v465_v55, %v455_v50  ;;  %v538_v55 = vld [vmem:[%s2964_s5 + $0x80] sm:$0xff] }
 0x35a   :  { %2219 = vmatprep.subr.mxu1 %v538_v55 }
 0x35b   :  { %v472_v59 = vadd.f32 %v470_v57, %v458_v45  ;;  %2220 = vmatpush3.msra.mxu1 %v538_v55 }
 0x35c   :  { %v475_v56 = vpop.permute.xlu1 %474 }
 0x35d   :  { %v480_v61 = vadd.f32 %v475_v56, %v472_v59  ;;  %v537_v59 = vld [vmem:[%s2964_s5 + $0x58] sm:$0xff] }
 0x35e   :  { %2221 = vmatprep.subr.mxu1 %v537_v59 }
 0x35f   :  { %2222 = vmatpush3.msra.mxu1 %v537_v59 }
 0x360   :  { %v467_v58 = vpop.permute.xlu1 %466 }
 0x361   :  { %v471_v62 = vadd.f32 %v467_v58, %v457_v53 }
 0x363   :  { %v473_v6 = vadd.f32 %v471_v62, %v460_v49  ;;  %v535_v62 = vld [vmem:[%s2964_s5 + $0x8] sm:$0xff] }
 0x364   :  { %v483_v60 = vpop.permute.xlu1 %482 }
 0x365   :  { %v488_v1 = vadd.f32 %v483_v60, %v480_v61  ;;  %v536_v60 = vld [vmem:[%s2964_s5 + $0x30] sm:$0xff] }
 0x366   :  { %v244_v63 = vpop.xlane.xlu0 %243  ;;  %2223 = vmatprep.subr.mxu1 %v536_v60 }
 0x367   :  { %v246_v2 = vmul.f32 0.010416667, %v244_v63  ;;  %2224 = vmatpush3.msra.mxu1 %v536_v60  ;;  %v2682_v63 = vld [vmem:[%s2964_s5 + $0x88] sm:$0xff] }
 0x368   :  { %v493_v3 = vpop.permute.xlu1 %492  ;;  %2225 = vmatprep.subr.mxu1 %v535_v62 }
 0x369   :  { %v2642_v4 = vsub.f32 %v236_v40, %v246_v2  ;;  %v498_v5 = vadd.f32 %v493_v3, %v488_v1  ;;  %2226 = vmatpush3.msra.mxu1 %v535_v62  ;;  %v2689_v3 = vld [vmem:[%s2964_s5 + $0x60] sm:$0xff] }
 0x36a   :  { %v477_v7 = vpop.permute.xlu0 %476  ;;  %2230 = vmatprep.subr.mxu1 %v2543_v0 }
 0x36b   :  { %v500_v8 = vmax.f32 %v498_v5, 0.0  ;;  %v481_v9 = vadd.f32 %v477_v7, %v473_v6  ;;  %v248_v13 = vmul.f32 %v2642_v4, %v2642_v4  ;;  %v2696_v5 = vld [vmem:[%s2964_s5 + $0x38] sm:$0xff]  ;;  %v2704_v6 = vld [vmem:[%s2964_s5 + $0x10] sm:$0xff] }
 0x36c   :  { %v485_v10 = vpop.permute.xlu1 %484 }
 0x36d   :  { %v489_v11 = vadd.f32 %v485_v10, %v481_v9  ;;  %v503_v12 = vsel %vm502_vm6, %v500_v8, -inf  ;;  %v249_v16 = vsel %vm241_vm5, %v248_v13, 0.0 }
 0x36e   :  { %504 = vmax.xlane.f32.xlu1 %v503_v12  ;;  %v2051_v12 = vld [vmem:[#allocation2 + $0x76] ss:$0 sm:$0xff] }
 0x370   :  { %v495_v14 = vpop.permute.xlu1 %494 }
 0x371   :  { %v499_v15 = vadd.f32 %v495_v14, %v489_v11  ;;  %v2047_v11 = vld [vmem:[#allocation2 + $0x75] ss:$0 sm:$0xff] }
 0x372   :  { %250 = vadd.xlane.f32.xlu1 %v249_v16 }
 0x373   :  { %v501_v17 = vmax.f32 %v499_v15, 0.0 }
 0x375   :  { %v506_v18 = vsel %vm502_vm6, %v501_v17, -inf }
 0x376   :  { %507 = vmax.xlane.f32.xlu0 %v506_v18 }
 0x3f7   :  { %v505_v31 = vpop.xlane.xlu1 %504 }
 0x3f8   :  { %v509_v32 = vsub.f32 %v500_v8, %v505_v31 }
 0x3fa   :  { %v511_v33 = vmul.f32 1.442695, %v509_v32 }
 0x3fb   :  { %v251_v34 = vpop.xlane.xlu1 %250 }
 0x3fc   :  { %2387 = vpow2.f32 %v511_v33  ;;  %v252_v35 = vmul.f32 0.010416667, %v251_v34 }
 0x3fe   :  { %v253_v36 = vadd.f32 1e-05, %v252_v35 }
 0x3ff   :  { %v508_v37 = vpop.xlane.xlu0 %507 }
 0x400   :  { %2389 = vrsqrt.f32 %v253_v36  ;;  %v510_v38 = vsub.f32 %v501_v17, %v508_v37 }
 0x402   :  { %v513_v39 = vmul.f32 1.442695, %v510_v38 }
 0x404   :  { %2391 = vpow2.f32 %v513_v39 }
 0x409   :  { %v2388_v40 = vpop.eup %2387 }
 0x40a   :  { %517 = vrot.lane.b32.xlu0 %v2388_v40, %s2546_s1 }
 0x40d   :  { %v2390_v41 = vpop.eup %2389 }
 0x40e   :  { %v255_v43 = vmul.f32 %v2390_v41, %v2642_v4 }
 0x410   :  { %v260_v45 = vmul.f32 %v2045_v42, %v255_v43 }
 0x411   :  { %v2392_v47 = vpop.eup %2391 }
 0x412   :  { %519 = vrot.lane.b32.xlu1 %v2392_v47, %s2546_s1  ;;  %v265_v48 = vadd.f32 %v2046_v44, %v260_v45 }
 0x414   :  { %v266_v49 = vmax.f32 %v265_v48, 0.0 }
 0x416   :  { %2217 = vmatmul.mubr.msk.f32.vlgmr.msra.gmra.mxu0 %vm284_vm7, %v266_v49 }
 0x417   :  { %2249 = vmatprep.mubr.msk.f32.mxu0 %vm2544_vm0, %v2543_v0  ;;  %2242 = vmatpush3.msra.mxu0 %v2682_v63 }
 0x418   :  { %2243 = vmatprep.subr.mxu0 %v2543_v0 }
 0x419   :  { %2244 = vmatpush3.msra.mxu0 %v2689_v3 }
 0x41a   :  { %2245 = vmatprep.subr.mxu0 %v2543_v0 }
 0x41b   :  { %2246 = vmatpush3.msra.mxu0 %v2696_v5 }
 0x41c   :  { %2247 = vmatprep.subr.mxu0 %v2543_v0 }
 0x41d   :  { %2248 = vmatpush3.msra.mxu0 %v2704_v6 }
 0x41e   :  { %2263 = vmatprep.subr.mxu0 %v2543_v0 }
 0x47c   :  { %v518_v50 = vpop.permute.xlu0 %517 }
 0x47d   :  { %v523_v51 = vsel %vm165_vm3, %v518_v50, 0.0 }
 0x47e   :  { %524 = vadd.xlane.f32.xlu1 %v523_v51 }
 0x484   :  { %v520_v53 = vpop.permute.xlu1 %519 }
 0x485   :  { %v526_v54 = vsel %vm165_vm3, %v520_v53, 0.0 }
 0x486   :  { %527 = vadd.xlane.f32.xlu0 %v526_v54 }
 0x4d6   :  { %v354_v56 = vpop.f32.mrf.mxu0 }
 0x4d8   :  { %v2218_v57 = vpop.f32.mrf.mxu0 }
 0x507   :  { %v525_v58 = vpop.xlane.xlu1 %524 }
 0x508   :  { %2393 = vrcp.f32 %v525_v58 }
 0x50f   :  { %v528_v61 = vpop.xlane.xlu0 %527 }
 0x510   :  { %2395 = vrcp.f32 %v528_v61 }
 0x515   :  { %v2394_v1 = vpop.eup %2393 }
 0x516   :  { %v531_v2 = vmul.f32 %v2394_v1, %v2388_v40 }
 0x518   :  { %v533_v4 = vmul.f32 %v531_v2, %v2629_v46 }
 0x51a   :  { %546 = vrot.lane.b32.xlu0 %v533_v4, %s2546_s1 }
 0x51d   :  { %v2396_v46 = vpop.eup %2395 }
 0x51e   :  { %v532_v7 = vmul.f32 %v2396_v46, %v2392_v47 }
 0x520   :  { %v534_v8 = vmul.f32 %v532_v7, %v2637_v52  ;;  %v355_v52 = vadd.f32 %v2047_v11, %v354_v56 }
 0x522   :  { %548 = vrot.lane.b32.xlu1 %v534_v8, %s2546_s1 }
 0x58c   :  { %v547_v9 = vpop.permute.xlu0 %546 }
 0x58d   :  { %2227 = vmatprep.mubr.msk.f32.mxu1 %vm165_vm3, %v547_v9 }
 0x594   :  { %v549_v10 = vpop.permute.xlu1 %548 }
 0x595   :  { %2228 = vmatmul.mubr.msk.f32.vlgmr.msra.gmra.mxu1 %vm165_vm3, %v549_v10 }
 0x596   :  { %2231 = vmatpush3.msra.mxu1 %v2682_v63  ;;  %2238 = vmatprep.mubr.msk.f32.mxu1 %vm2544_vm0, %v2543_v0 }
 0x597   :  { %2232 = vmatprep.subr.mxu1 %v2543_v0 }
 0x598   :  { %2233 = vmatpush3.msra.mxu1 %v2689_v3 }
 0x599   :  { %2234 = vmatprep.subr.mxu1 %v2543_v0 }
 0x59a   :  { %2235 = vmatpush3.msra.mxu1 %v2696_v5 }
 0x59b   :  { %2236 = vmatprep.subr.mxu1 %v2543_v0 }
 0x59c   :  { %2237 = vmatpush3.msra.mxu1 %v2704_v6 }
 0x59d   :  { %2239 = vmatmul.mubr.msk.f32.vlgmr.msra.gmra.mxu1 %vm165_vm3, %v355_v52  ;;  %2252 = vmatprep.subr.mxu1 %v2543_v0 }
 0x59e   :  { %2253 = vmatpush3.msra.mxu1 %v2682_v63  ;;  %2260 = vmatprep.mubr.msk.f32.mxu1 %vm2544_vm0, %v2543_v0 }
 0x59f   :  { %2254 = vmatprep.subr.mxu1 %v2543_v0 }
 0x5a0   :  { %2255 = vmatpush3.msra.mxu1 %v2689_v3 }
 0x5a1   :  { %2256 = vmatprep.subr.mxu1 %v2543_v0 }
 0x5a2   :  { %2257 = vmatpush3.msra.mxu1 %v2696_v5 }
 0x5a3   :  { %2258 = vmatprep.subr.mxu1 %v2543_v0 }
 0x5a4   :  { %2259 = vmatpush3.msra.mxu1 %v2704_v6 }
 0x5a5   :  { %2274 = vmatprep.subr.mxu1 %v2543_v0 }
 0x655   :  { %v2229_v13 = vpop.f32.mrf.mxu1 }
 0x656   :  { %v2734_v14 = vadd.f32 %v2229_v13, %v2051_v12 }
 0x657   :  { %v620_v15 = vpop.f32.mrf.mxu1 }
 0x658   :  { %v2736_v16 = vadd.f32 %v2051_v12, %v620_v15 }
 0x65d   :  { %v702_v17 = vpop.f32.mrf.mxu1 }
 0x65e   :  { %v706_v18 = vadd.f32 %v702_v17, %v2736_v16 }
 0x65f   :  { %v2240_v19 = vpop.f32.mrf.mxu1 }
 0x660   :  { %2397 = vtanh.f32 %v706_v18  ;;  %v2055_v21 = vmul.f32 -1.442695, %v706_v18 }
 0x662   :  { %2399 = vpow2.f32 %v2055_v21 }
 0x66d   :  { %v2398_v20 = vpop.eup %2397 }
 0x66e   :  { %716 = vrot.lane.b32.xlu1 %v2398_v20, %s2547_s23 }
 0x66f   :  { %v2400_v22 = vpop.eup %2399 }
 0x670   :  { %v710_v23 = vadd.f32 1.0, %v2400_v22 }
 0x672   :  { %2401 = vrcp.f32 %v710_v23 }
 0x67f   :  { %v2402_v24 = vpop.eup %2401 }
 0x680   :  { %v714_v27 = vmul.f32 %v2402_v24, %v355_v52 }
 0x6e0   :  { %v717_v25 = vpop.permute.xlu1 %716 }
 0x6e1   :  { %v719_v26 = vmul.f32 %v2402_v24, %v717_v25 }
 0x6e3   :  { %721 = vrot.lane.b32.xlu0 %v719_v26, %s2545_s22 }
 0x755   :  { %v722_v28 = vpop.permute.xlu0 %721 }
 0x756   :  { %v724_v29 = vadd.f32 %v722_v28, %v714_v27 }
 0x758   :  { %2403 = vtanh.f32 %v724_v29  ;;  %v818_v45 = vrot.slane %v724_v29, 6 }
 0x765   :  { %v2404_v30 = vpop.eup %2403 }
 0x766   :  { %727 = vrot.lane.b32.xlu1 %v2404_v30, %s2547_s23 }
 0x7d8   :  { %v728_v31 = vpop.permute.xlu1 %727 }
 0x7d9   :  { %v730_v32 = vmul.f32 %v2402_v24, %v728_v31 }
 0x7db   :  { %732 = vrot.lane.b32.xlu0 %v730_v32, %s2545_s22 }
 0x84d   :  { %v733_v33 = vpop.permute.xlu0 %732 }
 0x84e   :  { %2250 = vmatmul.mubr.msk.f32.vlgmr.msra.gmra.mxu0 %vm165_vm3, %v733_v33 }
 0x84f   :  { %2264 = vmatpush3.msra.mxu0 %v2682_v63  ;;  %2271 = vmatprep.mubr.msk.f32.mxu0 %vm2544_vm0, %v2543_v0 }
 0x850   :  { %2265 = vmatprep.subr.mxu0 %v2543_v0 }
 0x851   :  { %2266 = vmatpush3.msra.mxu0 %v2689_v3 }
 0x852   :  { %2267 = vmatprep.subr.mxu0 %v2543_v0 }
 0x853   :  { %2268 = vmatpush3.msra.mxu0 %v2696_v5 }
 0x854   :  { %2269 = vmatprep.subr.mxu0 %v2543_v0 }
 0x855   :  { %2270 = vmatpush3.msra.mxu0 %v2704_v6 }
 0x856   :  { %2285 = vmatprep.subr.mxu0 %v2543_v0 }
 0x90e   :  { %v802_v34 = vpop.f32.mrf.mxu0 }
 0x90f   :  { %v807_v35 = vrot.slane %v802_v34, 6 }
 0x910   :  { %v2251_v36 = vpop.f32.mrf.mxu0 }
 0x911   :  { %v809_v37 = vadd.f32 %v807_v35, %v2736_v16 }
 0x913   :  { %2405 = vtanh.f32 %v809_v37  ;;  %v2057_v39 = vmul.f32 -1.442695, %v809_v37 }
 0x915   :  { %2407 = vpow2.f32 %v2057_v39 }
 0x920   :  { %v2406_v38 = vpop.eup %2405 }
 0x921   :  { %822 = vrot.lane.b32.xlu1 %v2406_v38, %s2547_s23 }
 0x922   :  { %v2408_v40 = vpop.eup %2407 }
 0x923   :  { %v813_v41 = vadd.f32 1.0, %v2408_v40 }
 0x925   :  { %2409 = vrcp.f32 %v813_v41 }
 0x932   :  { %v2410_v42 = vpop.eup %2409 }
 0x933   :  { %v820_v47 = vmul.f32 %v2410_v42, %v818_v45 }
 0x993   :  { %v823_v43 = vpop.permute.xlu1 %822 }
 0x994   :  { %v825_v44 = vmul.f32 %v2410_v42, %v823_v43 }
 0x996   :  { %827 = vrot.lane.b32.xlu0 %v825_v44, %s2545_s22 }
 0xa08   :  { %v828_v48 = vpop.permute.xlu0 %827 }
 0xa09   :  { %v830_v49 = vadd.f32 %v828_v48, %v820_v47 }
 0xa0b   :  { %2411 = vtanh.f32 %v830_v49  ;;  %v925_v7 = vrot.slane %v830_v49, 6 }
 0xa18   :  { %v2412_v50 = vpop.eup %2411 }
 0xa19   :  { %833 = vrot.lane.b32.xlu1 %v2412_v50, %s2547_s23 }
 0xa8b   :  { %v834_v51 = vpop.permute.xlu1 %833 }
 0xa8c   :  { %v836_v53 = vmul.f32 %v2410_v42, %v834_v51 }
 0xa8e   :  { %v838_v54 = vrot.slane %v836_v53, 2 }
 0xa90   :  { %839 = vrot.lane.b32.xlu0 %v838_v54, %s2545_s22 }
 0xb02   :  { %v840_v55 = vpop.permute.xlu0 %839 }
 0xb03   :  { %2261 = vmatmul.mubr.msk.f32.vlgmr.msra.gmra.mxu1 %vm165_vm3, %v840_v55 }
 0xb04   :  { %2275 = vmatpush3.msra.mxu1 %v2682_v63  ;;  %2282 = vmatprep.mubr.msk.f32.mxu1 %vm2544_vm0, %v2543_v0 }
 0xb05   :  { %2276 = vmatprep.subr.mxu1 %v2543_v0 }
 0xb06   :  { %2277 = vmatpush3.msra.mxu1 %v2689_v3 }
 0xb07   :  { %2278 = vmatprep.subr.mxu1 %v2543_v0 }
 0xb08   :  { %2279 = vmatpush3.msra.mxu1 %v2696_v5 }
 0xb09   :  { %2280 = vmatprep.subr.mxu1 %v2543_v0 }
 0xb0a   :  { %2281 = vmatpush3.msra.mxu1 %v2704_v6 }
 0xb0b   :  { %2296 = vmatprep.subr.mxu1 %v2543_v0 }
 0xbc3   :  { %v909_v56 = vpop.f32.mrf.mxu1 }
 0xbc4   :  { %v914_v57 = vrot.slane %v909_v56, 4 }
 0xbc5   :  { %v2262_v58 = vpop.f32.mrf.mxu1 }
 0xbc6   :  { %v916_v59 = vadd.f32 %v914_v57, %v2736_v16 }
 0xbc8   :  { %2413 = vtanh.f32 %v916_v59  ;;  %v2059_v61 = vmul.f32 -1.442695, %v916_v59 }
 0xbca   :  { %2415 = vpow2.f32 %v2059_v61 }
 0xbd5   :  { %v2414_v60 = vpop.eup %2413 }
 0xbd6   :  { %929 = vrot.lane.b32.xlu1 %v2414_v60, %s2547_s23 }
 0xbd7   :  { %v2416_v62 = vpop.eup %2415 }
 0xbd8   :  { %v920_v1 = vadd.f32 1.0, %v2416_v62 }
 0xbda   :  { %2417 = vrcp.f32 %v920_v1 }
 0xbe7   :  { %v2418_v2 = vpop.eup %2417 }
 0xbe8   :  { %v927_v8 = vmul.f32 %v2418_v2, %v925_v7 }
 0xc48   :  { %v930_v4 = vpop.permute.xlu1 %929 }
 0xc49   :  { %v932_v46 = vmul.f32 %v2418_v2, %v930_v4 }
 0xc4b   :  { %934 = vrot.lane.b32.xlu0 %v932_v46, %s2545_s22 }
 0xcbd   :  { %v935_v9 = vpop.permute.xlu0 %934 }
 0xcbe   :  { %v937_v10 = vadd.f32 %v935_v9, %v927_v8 }
 0xcc0   :  { %2419 = vtanh.f32 %v937_v10  ;;  %v1032_v28 = vrot.slane %v937_v10, 6 }
 0xccd   :  { %v2420_v11 = vpop.eup %2419 }
 0xcce   :  { %940 = vrot.lane.b32.xlu1 %v2420_v11, %s2547_s23 }
 0xd40   :  { %v941_v52 = vpop.permute.xlu1 %940 }
 0xd41   :  { %v943_v12 = vmul.f32 %v2418_v2, %v941_v52 }
 0xd43   :  { %v945_v13 = vrot.slane %v943_v12, 4 }
 0xd45   :  { %946 = vrot.lane.b32.xlu0 %v945_v13, %s2545_s22 }
 0xdb7   :  { %v947_v15 = vpop.permute.xlu0 %946 }
 0xdb8   :  { %2272 = vmatmul.mubr.msk.f32.vlgmr.msra.gmra.mxu0 %vm165_vm3, %v947_v15 }
 0xdb9   :  { %2286 = vmatpush3.msra.mxu0 %v2682_v63  ;;  %2293 = vmatprep.mubr.msk.f32.mxu0 %vm2544_vm0, %v2543_v0 }
 0xdba   :  { %2287 = vmatprep.subr.mxu0 %v2543_v0 }
 0xdbb   :  { %2288 = vmatpush3.msra.mxu0 %v2689_v3 }
 0xdbc   :  { %2289 = vmatprep.subr.mxu0 %v2543_v0 }
 0xdbd   :  { %2290 = vmatpush3.msra.mxu0 %v2696_v5 }
 0xdbe   :  { %2291 = vmatprep.subr.mxu0 %v2543_v0 }
 0xdbf   :  { %2292 = vmatpush3.msra.mxu0 %v2704_v6 }
 0xdc0   :  { %2307 = vmatprep.subr.mxu0 %v2543_v0 }
 0xe78   :  { %v1016_v17 = vpop.f32.mrf.mxu0 }
 0xe79   :  { %v1021_v18 = vrot.slane %v1016_v17, 2 }
 0xe7a   :  { %v2273_v19 = vpop.f32.mrf.mxu0 }
 0xe7b   :  { %v1023_v20 = vadd.f32 %v1021_v18, %v2736_v16 }
 0xe7d   :  { %2421 = vtanh.f32 %v1023_v20  ;;  %v2061_v22 = vmul.f32 -1.442695, %v1023_v20 }
 0xe7f   :  { %2423 = vpow2.f32 %v2061_v22 }
 0xe8a   :  { %v2422_v21 = vpop.eup %2421 }
 0xe8b   :  { %1036 = vrot.lane.b32.xlu1 %v2422_v21, %s2547_s23 }
 0xe8c   :  { %v2424_v23 = vpop.eup %2423 }
 0xe8d   :  { %v1027_v24 = vadd.f32 1.0, %v2424_v23 }
 0xe8f   :  { %2425 = vrcp.f32 %v1027_v24 }
 0xe9c   :  { %v2426_v25 = vpop.eup %2425 }
 0xe9d   :  { %v1034_v29 = vmul.f32 %v2426_v25, %v1032_v28 }
 0xefd   :  { %v1037_v26 = vpop.permute.xlu1 %1036 }
 0xefe   :  { %v1039_v27 = vmul.f32 %v2426_v25, %v1037_v26 }
 0xf00   :  { %1041 = vrot.lane.b32.xlu0 %v1039_v27, %s2545_s22 }
 0xf72   :  { %v1042_v30 = vpop.permute.xlu0 %1041 }
 0xf73   :  { %v1044_v31 = vadd.f32 %v1042_v30, %v1034_v29 }
 0xf75   :  { %2427 = vtanh.f32 %v1044_v31  ;;  %v1136_v47 = vrot.slane %v1044_v31, 6 }
 0xf82   :  { %v2428_v16 = vpop.eup %2427 }
 0xf83   :  { %1047 = vrot.lane.b32.xlu1 %v2428_v16, %s2547_s23 }
 0xff5   :  { %v1048_v32 = vpop.permute.xlu1 %1047 }
 0xff6   :  { %v1050_v33 = vmul.f32 %v2426_v25, %v1048_v32 }
 0xff8   :  { %v1052_v34 = vrot.slane %v1050_v33, 6 }
 0xffa   :  { %1053 = vrot.lane.b32.xlu0 %v1052_v34, %s2545_s22 }
0x106c   :  { %v1054_v35 = vpop.permute.xlu0 %1053 }
0x106d   :  { %2283 = vmatmul.mubr.msk.f32.vlgmr.msra.gmra.mxu1 %vm165_vm3, %v1054_v35 }
0x106e   :  { %2297 = vmatpush3.msra.mxu1 %v2682_v63  ;;  %2304 = vmatprep.mubr.msk.f32.mxu1 %vm2544_vm0, %v2543_v0 }
0x106f   :  { %2298 = vmatprep.subr.mxu1 %v2543_v0 }
0x1070   :  { %2299 = vmatpush3.msra.mxu1 %v2689_v3 }
0x1071   :  { %2300 = vmatprep.subr.mxu1 %v2543_v0 }
0x1072   :  { %2301 = vmatpush3.msra.mxu1 %v2696_v5 }
0x1073   :  { %2302 = vmatprep.subr.mxu1 %v2543_v0 }
0x1074   :  { %2303 = vmatpush3.msra.mxu1 %v2704_v6 }
0x1075   :  { %2318 = vmatprep.subr.mxu1 %v2543_v0 }
0x112d   :  { %v1123_v36 = vpop.f32.mrf.mxu1 }
0x112e   :  { %v1127_v37 = vadd.f32 %v1123_v36, %v2734_v14 }
0x112f   :  { %v2284_v38 = vpop.f32.mrf.mxu1 }
0x1130   :  { %2429 = vtanh.f32 %v1127_v37  ;;  %v2063_v40 = vmul.f32 -1.442695, %v1127_v37 }
0x1132   :  { %2431 = vpow2.f32 %v2063_v40 }
0x113d   :  { %v2430_v39 = vpop.eup %2429 }
0x113e   :  { %1140 = vrot.lane.b32.xlu1 %v2430_v39, %s2547_s23 }
0x113f   :  { %v2432_v41 = vpop.eup %2431 }
0x1140   :  { %v1131_v42 = vadd.f32 1.0, %v2432_v41 }
0x1142   :  { %2433 = vrcp.f32 %v1131_v42 }
0x114f   :  { %v2434_v43 = vpop.eup %2433 }
0x1150   :  { %v1138_v48 = vmul.f32 %v2434_v43, %v1136_v47 }
0x11b0   :  { %v1141_v44 = vpop.permute.xlu1 %1140 }
0x11b1   :  { %v1143_v45 = vmul.f32 %v2434_v43, %v1141_v44 }
0x11b3   :  { %1145 = vrot.lane.b32.xlu0 %v1143_v45, %s2545_s22 }
0x1225   :  { %v1146_v49 = vpop.permute.xlu0 %1145 }
0x1226   :  { %v1148_v50 = vadd.f32 %v1146_v49, %v1138_v48  ;;  %v1478_v48 = vld [vmem:[%s2964_s5 + $0x68] sm:$0xff]  ;;  %v2849_v49 = vld [vmem:[%s2964_s5 + $0x98] sm:$0xff] }
0x1228   :  { %2435 = vtanh.f32 %v1148_v50 }
0x1235   :  { %v2436_v51 = vpop.eup %2435 }
0x1236   :  { %1151 = vrot.lane.b32.xlu1 %v2436_v51, %s2547_s23  ;;  %v1477_v51 = vld [vmem:[%s2964_s5 + $0x40] sm:$0xff] }
0x12a8   :  { %v1152_v53 = vpop.permute.xlu1 %1151 }
0x12a9   :  { %v1154_v54 = vmul.f32 %v2434_v43, %v1152_v53  ;;  %v2865_v53 = vld [vmem:[%s2964_s5 + $0x48] sm:$0xff] }
0x12ab   :  { %1156 = vrot.lane.b32.xlu0 %v1154_v54, %s2545_s22  ;;  %v1476_v54 = vld [vmem:[%s2964_s5 + $0x18] sm:$0xff] }
0x131d   :  { %v1157_v55 = vpop.permute.xlu0 %1156 }
0x131e   :  { %2294 = vmatmul.mubr.msk.f32.vlgmr.msra.gmra.mxu0 %vm165_vm3, %v1157_v55  ;;  %v1475_v55 = vld [vmem:[%s2961_s2] sm:$0xff]  ;;  %s2548_s2 = smov 33  }
0x131f   :  { %2308 = vmatpush3.msra.mxu0 %v2682_v63  ;;  %2315 = vmatprep.mubr.msk.f32.mxu0 %vm2544_vm0, %v2543_v0 }
0x1320   :  { %2309 = vmatprep.subr.mxu0 %v2543_v0 }
0x1321   :  { %2310 = vmatpush3.msra.mxu0 %v2689_v3 }
0x1322   :  { %2311 = vmatprep.subr.mxu0 %v2543_v0 }
0x1323   :  { %2312 = vmatpush3.msra.mxu0 %v2696_v5 }
0x1324   :  { %2313 = vmatprep.subr.mxu0 %v2543_v0 }
0x1325   :  { %2314 = vmatpush3.msra.mxu0 %v2704_v6  ;;  %v1242_v6 = vrot.slane %v1148_v50, 6  ;;  %v2854_v50 = vld [vmem:[%s2964_s5 + $0x70] sm:$0xff] }
0x1326   :  { %2329 = vmatprep.subr.mxu0 %v2543_v0 }
0x13de   :  { %v1226_v56 = vpop.f32.mrf.mxu0 }
0x13df   :  { %v1231_v57 = vrot.slane %v1226_v56, 6  ;;  %v2879_v56 = vld [vmem:[%s2964_s5 + $0x20] sm:$0xff] }
0x13e0   :  { %v2295_v63 = vpop.f32.mrf.mxu0 }
0x13e1   :  { %v1233_v58 = vadd.f32 %v1231_v57, %v2734_v14 }
0x13e3   :  { %2437 = vtanh.f32 %v1233_v58  ;;  %v2065_v3 = vmul.f32 -1.442695, %v1233_v58 }
0x13e5   :  { %2439 = vpow2.f32 %v2065_v3 }
0x13f0   :  { %v2438_v59 = vpop.eup %2437 }
0x13f1   :  { %1246 = vrot.lane.b32.xlu1 %v2438_v59, %s2547_s23 }
0x13f2   :  { %v2440_v60 = vpop.eup %2439 }
0x13f3   :  { %v1237_v61 = vadd.f32 1.0, %v2440_v60 }
0x13f5   :  { %2441 = vrcp.f32 %v1237_v61 }
0x1402   :  { %v2442_v5 = vpop.eup %2441 }
0x1403   :  { %v1244_v2 = vmul.f32 %v2442_v5, %v1242_v6 }
0x1463   :  { %v1247_v62 = vpop.permute.xlu1 %1246 }
0x1464   :  { %v1249_v1 = vmul.f32 %v2442_v5, %v1247_v62 }
0x1466   :  { %1251 = vrot.lane.b32.xlu0 %v1249_v1, %s2545_s22 }
0x14d8   :  { %v1252_v4 = vpop.permute.xlu0 %1251 }
0x14d9   :  { %v1254_v46 = vadd.f32 %v1252_v4, %v1244_v2 }
0x14db   :  { %2443 = vtanh.f32 %v1254_v46  ;;  %v1349_v24 = vrot.slane %v1254_v46, 6 }
0x14e8   :  { %v2444_v7 = vpop.eup %2443 }
0x14e9   :  { %1257 = vrot.lane.b32.xlu1 %v2444_v7, %s2547_s23 }
0x155b   :  { %v1258_v8 = vpop.permute.xlu1 %1257 }
0x155c   :  { %v1260_v9 = vmul.f32 %v2442_v5, %v1258_v8  ;;  %v2070_v5 = vld [vmem:[#allocation2 + $0x77] ss:$0 sm:$0xff] }
0x155e   :  { %v1262_v10 = vrot.slane %v1260_v9, 2 }
0x1560   :  { %1263 = vrot.lane.b32.xlu0 %v1262_v10, %s2545_s22 }
0x15d2   :  { %v1264_v11 = vpop.permute.xlu0 %1263 }
0x15d3   :  { %2305 = vmatmul.mubr.msk.f32.vlgmr.msra.gmra.mxu1 %vm165_vm3, %v1264_v11 }
0x15d4   :  { %2326 = vmatprep.mubr.msk.f32.mxu1 %vm2544_vm0, %v2543_v0 }
0x1693   :  { %v1333_v52 = vpop.f32.mrf.mxu1 }
0x1694   :  { %v1338_v12 = vrot.slane %v1333_v52, 4 }
0x1695   :  { %v2306_v13 = vpop.f32.mrf.mxu1 }
0x1696   :  { %v1340_v15 = vadd.f32 %v1338_v12, %v2734_v14 }
0x1698   :  { %2445 = vtanh.f32 %v1340_v15  ;;  %v2067_v18 = vmul.f32 -1.442695, %v1340_v15 }
0x169a   :  { %2447 = vpow2.f32 %v2067_v18 }
0x16a5   :  { %v2446_v17 = vpop.eup %2445 }
0x16a6   :  { %1353 = vrot.lane.b32.xlu1 %v2446_v17, %s2547_s23 }
0x16a7   :  { %v2448_v19 = vpop.eup %2447 }
0x16a8   :  { %v1344_v20 = vadd.f32 1.0, %v2448_v19 }
0x16aa   :  { %2449 = vrcp.f32 %v1344_v20 }
0x16b7   :  { %v2450_v21 = vpop.eup %2449 }
0x16b8   :  { %v1351_v25 = vmul.f32 %v2450_v21, %v1349_v24 }
0x1718   :  { %v1354_v22 = vpop.permute.xlu1 %1353 }
0x1719   :  { %v1356_v23 = vmul.f32 %v2450_v21, %v1354_v22 }
0x171b   :  { %1358 = vrot.lane.b32.xlu0 %v1356_v23, %s2545_s22 }
0x178d   :  { %v1359_v26 = vpop.permute.xlu0 %1358 }
0x178e   :  { %v1361_v27 = vadd.f32 %v1359_v26, %v1351_v25 }
0x1790   :  { %2451 = vtanh.f32 %v1361_v27  ;;  %v1456_v43 = vrot.slane %v1361_v27, 6 }
0x179d   :  { %v2452_v28 = vpop.eup %2451 }
0x179e   :  { %1364 = vrot.lane.b32.xlu1 %v2452_v28, %s2547_s23 }
0x1810   :  { %v1365_v29 = vpop.permute.xlu1 %1364 }
0x1811   :  { %v1367_v30 = vmul.f32 %v2450_v21, %v1365_v29 }
0x1813   :  { %v1369_v31 = vrot.slane %v1367_v30, 4 }
0x1815   :  { %1370 = vrot.lane.b32.xlu0 %v1369_v31, %s2545_s22 }
0x1887   :  { %v1371_v16 = vpop.permute.xlu0 %1370 }
0x1888   :  { %2316 = vmatmul.mubr.msk.f32.vlgmr.msra.gmra.mxu0 %vm165_vm3, %v1371_v16 }
0x1889   :  { %2337 = vmatprep.mubr.msk.f32.mxu0 %vm2544_vm0, %v2543_v0  ;;  %2330 = vmatpush3.msra.mxu0 %v2849_v49 }
0x188a   :  { %2331 = vmatprep.subr.mxu0 %v2543_v0 }
0x188b   :  { %2332 = vmatpush3.msra.mxu0 %v2854_v50 }
0x188c   :  { %2333 = vmatprep.subr.mxu0 %v2543_v0 }
0x188d   :  { %2334 = vmatpush3.msra.mxu0 %v2865_v53 }
0x188e   :  { %2335 = vmatprep.subr.mxu0 %v2543_v0 }
0x188f   :  { %2336 = vmatpush3.msra.mxu0 %v2879_v56 }
0x1890   :  { %2351 = vmatprep.subr.mxu0 %v2543_v0 }
0x1948   :  { %v1440_v32 = vpop.f32.mrf.mxu0 }
0x1949   :  { %v1445_v33 = vrot.slane %v1440_v32, 2 }
0x194a   :  { %v2317_v34 = vpop.f32.mrf.mxu0 }
0x194b   :  { %v1447_v35 = vadd.f32 %v1445_v33, %v2734_v14  ;;  %v1479_v14 = vld [vmem:[%s2964_s5 + $0x90] sm:$0xff] }
0x194c   :  { %2319 = vmatpush3.msra.mxu1 %v1479_v14 }
0x194d   :  { %2453 = vtanh.f32 %v1447_v35  ;;  %v2069_v37 = vmul.f32 -1.442695, %v1447_v35  ;;  %2320 = vmatprep.subr.mxu1 %v2543_v0 }
0x194e   :  { %2321 = vmatpush3.msra.mxu1 %v1478_v48 }
0x194f   :  { %2455 = vpow2.f32 %v2069_v37  ;;  %2322 = vmatprep.subr.mxu1 %v2543_v0 }
0x1950   :  { %2323 = vmatpush3.msra.mxu1 %v1477_v51 }
0x1951   :  { %2324 = vmatprep.subr.mxu1 %v2543_v0 }
0x1952   :  { %2325 = vmatpush3.msra.mxu1 %v1476_v54 }
0x1953   :  { %2327 = vmatmul.mubr.msk.f32.vlgmr.msra.gmra.mxu1 %vm165_vm3, %v1475_v55  ;;  %2340 = vmatprep.subr.mxu1 %v2543_v0 }
0x1954   :  { %2341 = vmatpush3.msra.mxu1 %v2849_v49  ;;  %2348 = vmatprep.mubr.msk.f32.mxu1 %vm2544_vm0, %v2543_v0 }
0x1955   :  { %2342 = vmatprep.subr.mxu1 %v2543_v0 }
0x1956   :  { %2343 = vmatpush3.msra.mxu1 %v2854_v50 }
0x1957   :  { %2344 = vmatprep.subr.mxu1 %v2543_v0 }
0x1958   :  { %2345 = vmatpush3.msra.mxu1 %v2865_v53 }
0x1959   :  { %2346 = vmatprep.subr.mxu1 %v2543_v0 }
0x195a   :  { %v2454_v36 = vpop.eup %2453  ;;  %2347 = vmatpush3.msra.mxu1 %v2879_v56 }
0x195b   :  { %1460 = vrot.lane.b32.xlu1 %v2454_v36, %s2547_s23  ;;  %2362 = vmatprep.subr.mxu1 %v2543_v0 }
0x195c   :  { %v2456_v38 = vpop.eup %2455 }
0x195d   :  { %v1451_v39 = vadd.f32 1.0, %v2456_v38 }
0x195f   :  { %2457 = vrcp.f32 %v1451_v39 }
0x196c   :  { %v2458_v40 = vpop.eup %2457 }
0x196d   :  { %v1458_v44 = vmul.f32 %v2458_v40, %v1456_v43 }
0x19cd   :  { %v1461_v41 = vpop.permute.xlu1 %1460 }
0x19ce   :  { %v1463_v42 = vmul.f32 %v2458_v40, %v1461_v41 }
0x19d0   :  { %1465 = vrot.lane.b32.xlu0 %v1463_v42, %s2545_s22 }
0x1a13   :  { %v1554_v3 = vpop.f32.mrf.mxu1 }
0x1a14   :  { %v2910_v62 = vadd.f32 %v2070_v5, %v1554_v3 }
0x1a15   :  { %v2328_v60 = vpop.f32.mrf.mxu1 }
0x1a42   :  { %v1466_v45 = vpop.permute.xlu0 %1465 }
0x1a43   :  { %v2837_v47 = vadd.f32 %v1466_v45, %v1458_v44 }
0x1a45   :  { %2459 = vtanh.f32 %v2837_v47  ;;  %v1647_v52 = vrot.slane %v2837_v47, 6 }
0x1a52   :  { %v2460_v57 = vpop.eup %2459 }
0x1a53   :  { %1471 = vrot.lane.b32.xlu1 %v2460_v57, %s2547_s23 }
0x1ac5   :  { %v1472_v63 = vpop.permute.xlu1 %1471 }
0x1ac6   :  { %v1474_v58 = vmul.f32 %v2458_v40, %v1472_v63 }
0x1ac8   :  { %v1563_v59 = vrot.slane %v1474_v58, 6 }
0x1aca   :  { %1564 = vrot.lane.b32.xlu0 %v1563_v59, %s2545_s22 }
0x1b3c   :  { %v1565_v61 = vpop.permute.xlu0 %1564 }
0x1b3d   :  { %2338 = vmatmul.mubr.msk.f32.vlgmr.msra.gmra.mxu0 %vm165_vm3, %v1565_v61 }
0x1b3e   :  { %2352 = vmatpush3.msra.mxu0 %v2849_v49  ;;  %2359 = vmatprep.mubr.msk.f32.mxu0 %vm2544_vm0, %v2543_v0 }
0x1b3f   :  { %2353 = vmatprep.subr.mxu0 %v2543_v0 }
0x1b40   :  { %2354 = vmatpush3.msra.mxu0 %v2854_v50 }
0x1b41   :  { %2355 = vmatprep.subr.mxu0 %v2543_v0 }
0x1b42   :  { %2356 = vmatpush3.msra.mxu0 %v2865_v53 }
0x1b43   :  { %2357 = vmatprep.subr.mxu0 %v2543_v0 }
0x1b44   :  { %2358 = vmatpush3.msra.mxu0 %v2879_v56 }
0x1bfd   :  { %v1634_v1 = vpop.f32.mrf.mxu0 }
0x1bfe   :  { %v1638_v6 = vadd.f32 %v1634_v1, %v2910_v62 }
0x1bff   :  { %v2339_v2 = vpop.f32.mrf.mxu0 }
0x1c00   :  { %2461 = vtanh.f32 %v1638_v6  ;;  %v2073_v46 = vmul.f32 -1.442695, %v1638_v6 }
0x1c02   :  { %2463 = vpow2.f32 %v2073_v46 }
0x1c0d   :  { %v2462_v4 = vpop.eup %2461 }
0x1c0e   :  { %1651 = vrot.lane.b32.xlu1 %v2462_v4, %s2547_s23 }
0x1c0f   :  { %v2464_v7 = vpop.eup %2463 }
0x1c10   :  { %v1642_v8 = vadd.f32 1.0, %v2464_v7 }
0x1c12   :  { %2465 = vrcp.f32 %v1642_v8 }
0x1c1f   :  { %v2466_v9 = vpop.eup %2465 }
0x1c20   :  { %v1649_v12 = vmul.f32 %v2466_v9, %v1647_v52 }
0x1c80   :  { %v1652_v10 = vpop.permute.xlu1 %1651 }
0x1c81   :  { %v1654_v11 = vmul.f32 %v2466_v9, %v1652_v10  ;;  %v2080_v10 = vld [vmem:[#allocation2 + $0x78] ss:$0 sm:$0xff] }
0x1c83   :  { %1656 = vrot.lane.b32.xlu0 %v1654_v11, %s2545_s22 }
0x1cf5   :  { %v1657_v13 = vpop.permute.xlu0 %1656 }
0x1cf6   :  { %v1659_v15 = vadd.f32 %v1657_v13, %v1649_v12 }
0x1cf8   :  { %2467 = vtanh.f32 %v1659_v15 }
0x1d05   :  { %v2468_v17 = vpop.eup %2467 }
0x1d06   :  { %1662 = vrot.lane.b32.xlu1 %v2468_v17, %s2547_s23 }
0x1d78   :  { %v1663_v18 = vpop.permute.xlu1 %1662 }
0x1d79   :  { %v2917_v19 = vmul.f32 %v2466_v9, %v1663_v18 }
0x1d7b   :  { %1667 = vrot.lane.b32.xlu0 %v2917_v19, %s2545_s22 }
0x1ded   :  { %v1668_v20 = vpop.permute.xlu0 %1667 }
0x1dee   :  { %2349 = vmatmul.mubr.msk.f32.vlgmr.msra.gmra.mxu1 %vm165_vm3, %v1668_v20 }
0x1def   :  { %2363 = vmatpush3.msra.mxu1 %v2849_v49  ;;  %2370 = vmatprep.mubr.msk.f32.mxu1 %vm2544_vm0, %v2543_v0 }
0x1df0   :  { %2364 = vmatprep.subr.mxu1 %v2543_v0 }
0x1df1   :  { %2365 = vmatpush3.msra.mxu1 %v2854_v50 }
0x1df2   :  { %2366 = vmatprep.subr.mxu1 %v2543_v0 }
0x1df3   :  { %2367 = vmatpush3.msra.mxu1 %v2865_v53 }
0x1df4   :  { %2368 = vmatprep.subr.mxu1 %v2543_v0  ;;  %v1753_v0 = vrot.slane %v1659_v15, 6 }
0x1df5   :  { %2369 = vmatpush3.msra.mxu1 %v2879_v56 }
0x1eae   :  { %v1737_v21 = vpop.f32.mrf.mxu1 }
0x1eaf   :  { %v1742_v22 = vrot.slane %v1737_v21, 6 }
0x1eb0   :  { %v2350_v23 = vpop.f32.mrf.mxu1 }
0x1eb1   :  { %v1744_v24 = vadd.f32 %v1742_v22, %v2910_v62 }
0x1eb3   :  { %2469 = vtanh.f32 %v1744_v24  ;;  %v2075_v26 = vmul.f32 -1.442695, %v1744_v24 }
0x1eb5   :  { %2471 = vpow2.f32 %v2075_v26 }
0x1ec0   :  { %v2470_v25 = vpop.eup %2469 }
0x1ec1   :  { %1757 = vrot.lane.b32.xlu1 %v2470_v25, %s2547_s23 }
0x1ec2   :  { %v2472_v27 = vpop.eup %2471 }
0x1ec3   :  { %v1748_v28 = vadd.f32 1.0, %v2472_v27 }
0x1ec5   :  { %2473 = vrcp.f32 %v1748_v28  ;;  %v2081_v28 = vld [vmem:[#allocation2 + $0x79] ss:$0 sm:$0xff] }
0x1ed2   :  { %v2474_v29 = vpop.eup %2473 }
0x1ed3   :  { %v1755_v16 = vmul.f32 %v2474_v29, %v1753_v0 }
0x1f33   :  { %v1758_v30 = vpop.permute.xlu1 %1757 }
0x1f34   :  { %v1760_v31 = vmul.f32 %v2474_v29, %v1758_v30 }
0x1f36   :  { %1762 = vrot.lane.b32.xlu0 %v1760_v31, %s2545_s22 }
0x1fa8   :  { %v1763_v32 = vpop.permute.xlu0 %1762 }
0x1fa9   :  { %v1765_v33 = vadd.f32 %v1763_v32, %v1755_v16 }
0x1fab   :  { %2475 = vtanh.f32 %v1765_v33  ;;  %v1860_v50 = vrot.slane %v1765_v33, 6 }
0x1fb8   :  { %v2476_v34 = vpop.eup %2475 }
0x1fb9   :  { %1768 = vrot.lane.b32.xlu1 %v2476_v34, %s2547_s23 }
0x202b   :  { %v1769_v35 = vpop.permute.xlu1 %1768 }
0x202c   :  { %v1771_v36 = vmul.f32 %v2474_v29, %v1769_v35 }
0x202e   :  { %v1773_v37 = vrot.slane %v1771_v36, 2  ;;  %v1987_v63 = vsel %vm1986_vm8, %v2917_v19, %v1771_v36 }
0x2030   :  { %1774 = vrot.lane.b32.xlu0 %v1773_v37, %s2545_s22 }
0x20a2   :  { %v1775_v38 = vpop.permute.xlu0 %1774 }
0x20a3   :  { %2360 = vmatmul.mubr.msk.f32.vlgmr.msra.gmra.mxu0 %vm165_vm3, %v1775_v38 }
0x2163   :  { %v1844_v39 = vpop.f32.mrf.mxu0 }
0x2164   :  { %v1849_v40 = vrot.slane %v1844_v39, 4 }
0x2165   :  { %v2361_v41 = vpop.f32.mrf.mxu0 }
0x2166   :  { %v1851_v42 = vadd.f32 %v1849_v40, %v2910_v62 }
0x2168   :  { %2477 = vtanh.f32 %v1851_v42  ;;  %v2077_v44 = vmul.f32 -1.442695, %v1851_v42 }
0x216a   :  { %2479 = vpow2.f32 %v2077_v44 }
0x2175   :  { %v2478_v43 = vpop.eup %2477 }
0x2176   :  { %1864 = vrot.lane.b32.xlu1 %v2478_v43, %s2547_s23 }
0x2177   :  { %v2480_v45 = vpop.eup %2479 }
0x2178   :  { %v1855_v47 = vadd.f32 1.0, %v2480_v45 }
0x217a   :  { %2481 = vrcp.f32 %v1855_v47 }
0x2187   :  { %v2482_v14 = vpop.eup %2481 }
0x2188   :  { %v1862_v51 = vmul.f32 %v2482_v14, %v1860_v50 }
0x21e8   :  { %v1865_v48 = vpop.permute.xlu1 %1864 }
0x21e9   :  { %v1867_v49 = vmul.f32 %v2482_v14, %v1865_v48 }
0x21eb   :  { %1869 = vrot.lane.b32.xlu0 %v1867_v49, %s2545_s22 }
0x225d   :  { %v1870_v53 = vpop.permute.xlu0 %1869 }
0x225e   :  { %v1872_v54 = vadd.f32 %v1870_v53, %v1862_v51 }
0x2260   :  { %2483 = vtanh.f32 %v1872_v54  ;;  %v1967_v11 = vrot.slane %v1872_v54, 6 }
0x226d   :  { %v2484_v55 = vpop.eup %2483 }
0x226e   :  { %1875 = vrot.lane.b32.xlu1 %v2484_v55, %s2547_s23 }
0x22e0   :  { %v1876_v56 = vpop.permute.xlu1 %1875 }
0x22e1   :  { %v1878_v57 = vmul.f32 %v2482_v14, %v1876_v56 }
0x22e3   :  { %v1880_v58 = vrot.slane %v1878_v57, 4  ;;  %v1989_v59 = vsel %vm1988_vm9, %v1987_v63, %v1878_v57 }
0x22e5   :  { %1881 = vrot.lane.b32.xlu0 %v1880_v58, %s2545_s22 }
0x2357   :  { %v1882_v3 = vpop.permute.xlu0 %1881 }
0x2358   :  { %2371 = vmatmul.mubr.msk.f32.vlgmr.msra.gmra.mxu1 %vm165_vm3, %v1882_v3 }
0x2418   :  { %v1951_v60 = vpop.f32.mrf.mxu1 }
0x2419   :  { %v1956_v61 = vrot.slane %v1951_v60, 2 }
0x241a   :  { %v2372_v5 = vpop.f32.mrf.mxu1 }
0x241b   :  { %v1958_v1 = vadd.f32 %v1956_v61, %v2910_v62 }
0x241d   :  { %2485 = vtanh.f32 %v1958_v1  ;;  %v2079_v2 = vmul.f32 -1.442695, %v1958_v1 }
0x241f   :  { %2487 = vpow2.f32 %v2079_v2 }
0x242a   :  { %v2486_v6 = vpop.eup %2485 }
0x242b   :  { %1971 = vrot.lane.b32.xlu1 %v2486_v6, %s2547_s23 }
0x242c   :  { %v2488_v4 = vpop.eup %2487 }
0x242d   :  { %v1962_v46 = vadd.f32 1.0, %v2488_v4 }
0x242f   :  { %2489 = vrcp.f32 %v1962_v46 }
0x243c   :  { %v2490_v7 = vpop.eup %2489 }
0x243d   :  { %v1969_v52 = vmul.f32 %v2490_v7, %v1967_v11 }
0x249d   :  { %v1972_v8 = vpop.permute.xlu1 %1971 }
0x249e   :  { %v1974_v9 = vmul.f32 %v2490_v7, %v1972_v8 }
0x24a0   :  { %1976 = vrot.lane.b32.xlu0 %v1974_v9, %s2545_s22 }
0x24a4   :  { %1998 = vrot.lane.b32.xlu0 %v2080_v10, %s2546_s1 }
0x2512   :  { %v1977_v62 = vpop.permute.xlu0 %1976 }
0x2513   :  { %v1979_v12 = vadd.f32 %v1977_v62, %v1969_v52 }
0x2515   :  { %2491 = vtanh.f32 %v1979_v12  ;;  %v2019_v13 = vrot.slane %v1979_v12, 4 }
0x2516   :  { %v1999_v17 = vpop.permute.xlu0 %1998 }
0x2517   :  { %2020 = vrot.lane.b32.xlu0 %v2019_v13, %s2547_s23 }
0x2522   :  { %v2492_v15 = vpop.eup %2491 }
0x2523   :  { %1982 = vrot.lane.b32.xlu1 %v2492_v15, %s2547_s23 }
0x2589   :  { %v2021_v22 = vpop.permute.xlu0 %2020 }
0x2595   :  { %v1983_v18 = vpop.permute.xlu1 %1982 }
0x2596   :  { %v1985_v19 = vmul.f32 %v2490_v7, %v1983_v18 }
0x2598   :  { %v2016_v20 = vrot.slane %v1985_v19, 6  ;;  %v1991_v21 = vsel %vm1990_vm10, %v1989_v59, %v1985_v19 }
0x2599   :  { %v2001_v23 = vmul.f32 %v1999_v17, %v1991_v21 }
0x259a   :  { %v2023_v24 = vsel %vm1986_vm8, %v2016_v20, %v2021_v22 }
0x259b   :  { %2003 = vrot.lane.b32.xlu1 %v2001_v23, %s2545_s22  ;;  %v2024_v25 = vsel %vm1988_vm9, %v2023_v24, 0.0 }
0x259c   :  { %2026 = vrot.lane.b32.xlu0 %v2024_v25, %s2548_s2 }
0x260d   :  { %v2004_v26 = vpop.permute.xlu1 %2003 }
0x260e   :  { %v2006_v27 = vsel %vm165_vm3, %v2004_v26, 0.0  ;;  %v2027_v31 = vpop.permute.xlu0 %2026 }
0x260f   :  { %2007 = vadd.xlane.f32.xlu1 %v2006_v27 }
0x2698   :  { %v2008_v29 = vpop.xlane.xlu1 %2007 }
0x2699   :  { %v2014_v30 = vadd.f32 %v2081_v28, %v2008_v29 }
0x269b   :  { %v2030_v0 = vsel %vm2029_vm11, %v2014_v30, %v2027_v31 }
0x269c   :  { %v2032_v16 = vsel %vm2031_vm12, %v2030_v0, 0.0 }
0x269d   :  { %2033 = vst [vmem:[%s2965_s6] sm:$0xff] %v2032_v16 }
0x269e   :  { %2038 = vsyncpa [#allocation3], 1 }
0x269f   :  { %2039 = vsyncpa [#allocation5], 1 }

</bundles_post_ra>
